<compile_context>
chip_gen: v7x
topology: tpu7x:2x2x1
jax: 0.10.0
libtpu: 0.0.40
codegen_flags: <defaults>
</compile_context>

<pallas_src>
import functools

import jax
import jax.numpy as jnp
import numpy as np
from jax.experimental import pallas as pl
from jax.experimental.pallas import tpu as pltpu


# ------------------------------ Kernel ---------------------------------------
def mha_kernel(x_ref, wqkv_ref, bqkv_ref, wo_ref, bo_ref, out_ref, *, heads):
    L, D = x_ref.shape
    hd = D // heads
    scale = 1.0 / (hd ** 0.5)

    # bf16 MXU inputs, f32 accumulation.
    x = x_ref[...].astype(jnp.bfloat16)              # (L, D)
    wqkv = wqkv_ref[...].astype(jnp.bfloat16)        # (3D, D)
    bqkv = bqkv_ref[...]                             # (1, 3D)  f32
    wo = wo_ref[...].astype(jnp.bfloat16)            # (D, D)
    bo = bo_ref[...]                                 # (1, D)   f32

    qkv = jnp.dot(x, wqkv.T, preferred_element_type=jnp.float32) + bqkv   # (L, 3D)
    q = qkv[:, :D]
    k = qkv[:, D:2 * D]
    v = qkv[:, 2 * D:]

    # (L, D) -> (H, L, hd): one batched computation over all heads.
    qh = (q * scale).reshape(L, heads, hd).transpose(1, 0, 2)
    kh = k.reshape(L, heads, hd).transpose(1, 0, 2)
    vh = v.reshape(L, heads, hd).transpose(1, 0, 2)

    s = jnp.einsum('hqd,hkd->hqk',
                   qh.astype(jnp.bfloat16), kh.astype(jnp.bfloat16),
                   preferred_element_type=jnp.float32)                    # (H, L, L)
    s = s - jnp.max(s, axis=-1, keepdims=True)
    p = jnp.exp(s)
    p = p * pl.reciprocal(jnp.sum(p, axis=-1, keepdims=True), approx=True)

    o = jnp.einsum('hqk,hkd->hqd',
                   p.astype(jnp.bfloat16), vh.astype(jnp.bfloat16),
                   preferred_element_type=jnp.float32)                    # (H, L, hd)
    attn = o.transpose(1, 0, 2).reshape(L, D)                             # (L, D)

    y = jnp.dot(attn.astype(jnp.bfloat16), wo.T,
                preferred_element_type=jnp.float32) + bo                  # (L, D)
    out_ref[...] = y.astype(out_ref.dtype)


# ------------------------------ Wrapper ---------------------------------------
def mha_forward(x, wqkv, bqkv, wo, bo, *, heads):
    B, L, D = x.shape
    return pl.pallas_call(
        functools.partial(mha_kernel, heads=heads),
        out_shape=jax.ShapeDtypeStruct((B, L, D), x.dtype),
        grid_spec=pltpu.PrefetchScalarGridSpec(
            num_scalar_prefetch=0,
            grid=(B,),
            in_specs=[
                pl.BlockSpec((pl.Squeezed(), L, D), lambda b: (b, 0, 0)),  # x (per batch)
                pl.BlockSpec((3 * D, D), lambda b: (0, 0)),                # in_proj W
                pl.BlockSpec((1, 3 * D), lambda b: (0, 0)),                # in_proj b
                pl.BlockSpec((D, D), lambda b: (0, 0)),                    # out_proj W
                pl.BlockSpec((1, D), lambda b: (0, 0)),                    # out_proj b
            ],
            out_specs=pl.BlockSpec((pl.Squeezed(), L, D), lambda b: (b, 0, 0)),
        ),
        compiler_params=pltpu.CompilerParams(
            dimension_semantics=("parallel",)),     # batch axis across TCs (v7x)
    )(x, wqkv, bqkv, wo, bo)


# --------------------------- Pure-JAX reference --------------------------------
def mha_ref(x, wqkv, bqkv, wo, bo, *, heads):
    B, L, D = x.shape
    hd = D // heads
    qkv = jnp.einsum('bld,ed->ble', x, wqkv) + bqkv[0]
    q, k, v = qkv[..., :D], qkv[..., D:2 * D], qkv[..., 2 * D:]
    qh = q.reshape(B, L, heads, hd).transpose(0, 2, 1, 3)
    kh = k.reshape(B, L, heads, hd).transpose(0, 2, 1, 3)
    vh = v.reshape(B, L, heads, hd).transpose(0, 2, 1, 3)
    s = jnp.einsum('bhqd,bhkd->bhqk', qh, kh) / jnp.sqrt(hd)
    p = jax.nn.softmax(s, axis=-1)
    o = jnp.einsum('bhqk,bhkd->bhqd', p, vh).transpose(0, 2, 1, 3).reshape(B, L, D)
    return jnp.einsum('bld,ed->ble', o, wo) + bo[0]


# --------------------------------- Main ----------------------------------------
if __name__ == "__main__":
    B, L, D, HEADS = 2, 16, 128, 4     # batch, seq, embed dim (lane-dense), heads

    key = jax.random.PRNGKey(0)
    ks = jax.random.split(key, 6)
    x = jax.random.normal(ks[0], (B, L, D), dtype=jnp.float32)

    # nn.MultiheadAttention parameters: in_proj (3D, D)+(3D,), out_proj (D, D)+(D,).
    wqkv = 0.05 * jax.random.normal(ks[1], (3 * D, D), dtype=jnp.float32)
    bqkv = 0.05 * jax.random.normal(ks[2], (1, 3 * D), dtype=jnp.float32)
    wo = 0.05 * jax.random.normal(ks[3], (D, D), dtype=jnp.float32)
    bo = 0.05 * jax.random.normal(ks[4], (1, D), dtype=jnp.float32)

    out = mha_forward(x, wqkv, bqkv, wo, bo, heads=HEADS)
    out = jax.block_until_ready(out)

    ref = mha_ref(x, wqkv, bqkv, wo, bo, heads=HEADS)
    # bf16 MXU inputs + approx reciprocal -> loose-but-tight-enough tolerances.
    np.testing.assert_allclose(np.asarray(out), np.asarray(ref), rtol=2e-2, atol=2e-2)

    print("KERNEL_OK")
</pallas_src>

<mosaic_0001>
module attributes {stable_mosaic.version = 11 : i64} {
  func.func @mha_kernel(%arg0: i32, %arg1: memref<1x16x128xf32, #tpu.memory_space<vmem>>, %arg2: memref<384x128xf32, #tpu.memory_space<vmem>>, %arg3: memref<1x384xf32, #tpu.memory_space<vmem>>, %arg4: memref<128x128xf32, #tpu.memory_space<vmem>>, %arg5: memref<1x128xf32, #tpu.memory_space<vmem>>, %arg6: memref<1x16x128xf32, #tpu.memory_space<vmem>>) attributes {dimension_semantics = [#tpu.dimension_semantics<parallel>], iteration_bounds = array<i64: 2>, scalar_prefetch = 0 : i64, scratch_operands = 0 : i64, tpu.core_type = #tpu.core_type<tc>, window_params = [{transform_indices = @transform_0, window_bounds = array<i64: 1, 16, 128>}, {pipeline_mode = #tpu.pipeline_mode<synchronous>, transform_indices = @transform_1, window_bounds = array<i64: 384, 128>}, {pipeline_mode = #tpu.pipeline_mode<synchronous>, transform_indices = @transform_2, window_bounds = array<i64: 1, 384>}, {pipeline_mode = #tpu.pipeline_mode<synchronous>, transform_indices = @transform_3, window_bounds = array<i64: 128, 128>}, {pipeline_mode = #tpu.pipeline_mode<synchronous>, transform_indices = @transform_4, window_bounds = array<i64: 1, 128>}, {transform_indices = @transform_5, window_bounds = array<i64: 1, 16, 128>}]} {
    %c0 = arith.constant 0 : index
    %c0_0 = arith.constant 0 : index
    %c0_1 = arith.constant 0 : index
    %0 = vector.load %arg1[%c0, %c0_0, %c0_1] : memref<1x16x128xf32, #tpu.memory_space<vmem>>, vector<1x16x128xf32>
    %1 = vector.shape_cast %0 : vector<1x16x128xf32> to vector<16x128xf32>
    %2 = arith.truncf %1 : vector<16x128xf32> to vector<16x128xbf16>
    %c0_2 = arith.constant 0 : index
    %c0_3 = arith.constant 0 : index
    %3 = vector.load %arg2[%c0_2, %c0_3] : memref<384x128xf32, #tpu.memory_space<vmem>>, vector<384x128xf32>
    %4 = arith.truncf %3 : vector<384x128xf32> to vector<384x128xbf16>
    %c0_4 = arith.constant 0 : index
    %c0_5 = arith.constant 0 : index
    %5 = vector.load %arg3[%c0_4, %c0_5] : memref<1x384xf32, #tpu.memory_space<vmem>>, vector<1x384xf32>
    %c0_6 = arith.constant 0 : index
    %c0_7 = arith.constant 0 : index
    %6 = vector.load %arg4[%c0_6, %c0_7] : memref<128x128xf32, #tpu.memory_space<vmem>>, vector<128x128xf32>
    %7 = arith.truncf %6 : vector<128x128xf32> to vector<128x128xbf16>
    %c0_8 = arith.constant 0 : index
    %c0_9 = arith.constant 0 : index
    %8 = vector.load %arg5[%c0_8, %c0_9] : memref<1x128xf32, #tpu.memory_space<vmem>>, vector<1x128xf32>
    %9 = tpu.transpose %4, [1, 0] : vector<384x128xbf16> -> vector<128x384xbf16>
    %cst = arith.constant dense<0.000000e+00> : vector<16x384xf32>
    %10 = tpu.matmul %2, %9, %cst {dimension_numbers = #tpu.dot_dimension_numbers<[1], [0], [0], [1], [0, 0, 1, 1], [], []>} : vector<16x128xbf16>, vector<128x384xbf16>, vector<16x384xf32> -> vector<16x384xf32>
    %11 = vector.broadcast %5 : vector<1x384xf32> to vector<16x384xf32>
    %12 = arith.addf %10, %11 : vector<16x384xf32>
    %13 = vector.extract_strided_slice %12 {offsets = [0, 0], sizes = [16, 128], strides = [1, 1]} : vector<16x384xf32> to vector<16x128xf32>
    %14 = vector.extract_strided_slice %12 {offsets = [0, 128], sizes = [16, 128], strides = [1, 1]} : vector<16x384xf32> to vector<16x128xf32>
    %15 = vector.extract_strided_slice %12 {offsets = [0, 256], sizes = [16, 128], strides = [1, 1]} : vector<16x384xf32> to vector<16x128xf32>
    %cst_10 = arith.constant 0.176776692 : f32
    %16 = vector.broadcast %cst_10 : f32 to vector<16x128xf32>
    %17 = arith.mulf %13, %16 : vector<16x128xf32>
    %18 = vector.shape_cast %17 : vector<16x128xf32> to vector<16x4x32xf32>
    %19 = tpu.transpose %18, [1, 0, 2] : vector<16x4x32xf32> -> vector<4x16x32xf32>
    %20 = vector.shape_cast %14 : vector<16x128xf32> to vector<16x4x32xf32>
    %21 = tpu.transpose %20, [1, 0, 2] : vector<16x4x32xf32> -> vector<4x16x32xf32>
    %22 = vector.shape_cast %15 : vector<16x128xf32> to vector<16x4x32xf32>
    %23 = tpu.transpose %22, [1, 0, 2] : vector<16x4x32xf32> -> vector<4x16x32xf32>
    %24 = arith.truncf %19 : vector<4x16x32xf32> to vector<4x16x32xbf16>
    %25 = arith.truncf %21 : vector<4x16x32xf32> to vector<4x16x32xbf16>
    "tpu.trace_start"() <{level = 10 : i32, message = "hqd,hkd->hqk"}> : () -> ()
    %cst_11 = arith.constant dense<0.000000e+00> : vector<4x16x16xf32>
    %26 = tpu.matmul %24, %25, %cst_11 {dimension_numbers = #tpu.dot_dimension_numbers<[2], [2], [1], [1], [0, 0, 0, 1, 1, 1], [0], [0]>} : vector<4x16x32xbf16>, vector<4x16x32xbf16>, vector<4x16x16xf32> -> vector<4x16x16xf32>
    "tpu.trace_stop"() : () -> ()
    %cst_12 = arith.constant dense<0xFF800000> : vector<4x16xf32>
    %27 = vector.multi_reduction <maximumf>, %26, %cst_12 [2] : vector<4x16x16xf32> to vector<4x16xf32>
    %28 = vector.shape_cast %27 : vector<4x16xf32> to vector<4x16x1xf32>
    %29 = vector.broadcast %28 : vector<4x16x1xf32> to vector<4x16x16xf32>
    %30 = arith.subf %26, %29 : vector<4x16x16xf32>
    %31 = math.exp %30 : vector<4x16x16xf32>
    %cst_13 = arith.constant dense<0.000000e+00> : vector<4x16xf32>
    %32 = vector.multi_reduction <add>, %31, %cst_13 [2] : vector<4x16x16xf32> to vector<4x16xf32>
    %33 = vector.shape_cast %32 : vector<4x16xf32> to vector<4x16x1xf32>
    %34 = tpu.reciprocal %33 {approx = true} : vector<4x16x1xf32> -> vector<4x16x1xf32>
    %35 = vector.broadcast %34 : vector<4x16x1xf32> to vector<4x16x16xf32>
    %36 = arith.mulf %31, %35 : vector<4x16x16xf32>
    %37 = arith.truncf %36 : vector<4x16x16xf32> to vector<4x16x16xbf16>
    %38 = arith.truncf %23 : vector<4x16x32xf32> to vector<4x16x32xbf16>
    "tpu.trace_start"() <{level = 10 : i32, message = "hqk,hkd->hqd"}> : () -> ()
    %cst_14 = arith.constant dense<0.000000e+00> : vector<4x16x32xf32>
    %39 = tpu.matmul %37, %38, %cst_14 {dimension_numbers = #tpu.dot_dimension_numbers<[2], [1], [1], [2], [0, 0, 0, 1, 1, 2], [0], [0]>} : vector<4x16x16xbf16>, vector<4x16x32xbf16>, vector<4x16x32xf32> -> vector<4x16x32xf32>
    "tpu.trace_stop"() : () -> ()
    %40 = tpu.transpose %39, [1, 0, 2] : vector<4x16x32xf32> -> vector<16x4x32xf32>
    %41 = vector.shape_cast %40 : vector<16x4x32xf32> to vector<16x128xf32>
    %42 = arith.truncf %41 : vector<16x128xf32> to vector<16x128xbf16>
    %43 = tpu.transpose %7, [1, 0] : vector<128x128xbf16> -> vector<128x128xbf16>
    %cst_15 = arith.constant dense<0.000000e+00> : vector<16x128xf32>
    %44 = tpu.matmul %42, %43, %cst_15 {dimension_numbers = #tpu.dot_dimension_numbers<[1], [0], [0], [1], [0, 0, 1, 1], [], []>} : vector<16x128xbf16>, vector<128x128xbf16>, vector<16x128xf32> -> vector<16x128xf32>
    %45 = vector.broadcast %8 : vector<1x128xf32> to vector<16x128xf32>
    %46 = arith.addf %44, %45 : vector<16x128xf32>
    %c0_16 = arith.constant 0 : index
    %c0_17 = arith.constant 0 : index
    %c0_18 = arith.constant 0 : index
    %47 = vector.load %arg6[%c0_16, %c0_17, %c0_18] : memref<1x16x128xf32, #tpu.memory_space<vmem>>, vector<1x16x128xf32>
    %48 = vector.shape_cast %47 : vector<1x16x128xf32> to vector<16x128xf32>
    %49 = vector.shape_cast %46 : vector<16x128xf32> to vector<1x16x128xf32>
    tpu.vector_store %arg6[%c0_16, %c0_17, %c0_18], %49 {strides = array<i32>} : memref<1x16x128xf32, #tpu.memory_space<vmem>>, vector<1x16x128xf32>,
    return
  }
  func.func @transform_0(%arg0: i32) -> (i32, i32, i32) {
    %c0_i32 = arith.constant 0 : i32
    %c0_i32_0 = arith.constant 0 : i32
    %c0_i32_1 = arith.constant 0 : i32
    return %arg0, %c0_i32, %c0_i32_0 : i32, i32, i32
  }
  func.func @transform_1(%arg0: i32) -> (i32, i32) {
    %c0_i32 = arith.constant 0 : i32
    %c0_i32_0 = arith.constant 0 : i32
    %c0_i32_1 = arith.constant 0 : i32
    return %c0_i32, %c0_i32_0 : i32, i32
  }
  func.func @transform_2(%arg0: i32) -> (i32, i32) {
    %c0_i32 = arith.constant 0 : i32
    %c0_i32_0 = arith.constant 0 : i32
    %c0_i32_1 = arith.constant 0 : i32
    return %c0_i32, %c0_i32_0 : i32, i32
  }
  func.func @transform_3(%arg0: i32) -> (i32, i32) {
    %c0_i32 = arith.constant 0 : i32
    %c0_i32_0 = arith.constant 0 : i32
    %c0_i32_1 = arith.constant 0 : i32
    return %c0_i32, %c0_i32_0 : i32, i32
  }
  func.func @transform_4(%arg0: i32) -> (i32, i32) {
    %c0_i32 = arith.constant 0 : i32
    %c0_i32_0 = arith.constant 0 : i32
    %c0_i32_1 = arith.constant 0 : i32
    return %c0_i32, %c0_i32_0 : i32, i32
  }
  func.func @transform_5(%arg0: i32) -> (i32, i32, i32) {
    %c0_i32 = arith.constant 0 : i32
    %c0_i32_0 = arith.constant 0 : i32
    %c0_i32_1 = arith.constant 0 : i32
    return %arg0, %c0_i32, %c0_i32_0 : i32, i32, i32
  }
}

</mosaic_0001>

<bundles_post_ra>
// kernel: tpu_custom_call.1
= control target key start
LH: loop header
LB: loop body
LE: loop exit
PB: predicated region body
PF: predicated region fallthrough
CT: control target
= control target key end

     0   :  { %10 = vsyncpa [#allocation3], 0  ;;  %s3384_s0 = inlined_call_operand.hbm [shape: f32[2,16,128], index: 0, kind: input, shape index: {}]   ;;  %s3385_s1 = inlined_call_operand.hbm [shape: f32[384,128], index: 1, kind: input, shape index: {}]   ;;  %s3386_s2 = inlined_call_operand.vmem [shape: f32[1,384], index: 2, kind: input, shape index: {}]   ;;  %s3387_s3 = inlined_call_operand.hbm [shape: f32[128,128], index: 3, kind: input, shape index: {}]   ;;  %s3388_s4 = inlined_call_operand.vmem [shape: f32[1,128], index: 4, kind: input, shape index: {}]   ;;  %s3389_s5 = inlined_call_operand.hbm [shape: f32[2,16,128], index: 5, kind: output, shape index: {}]  }
   0x1   :  { %12 = vsyncpa [#allocation3 + $0x1], 0 }
   0x2   :  { %13 = vsyncpa [#allocation6], 0 }
   0x3   :  { %14 = vsyncpa [#allocation4], 0 }
   0x4   :  { %16 = vsyncpa [#allocation4 + $0x1], 0  ;;  %s2795_s18 = smov 0   ;;  %s2797_s19 = smov 0  }
   0x5   :  { %s2799_s20 = smov 0   ;;  %s2801_s21 = smov 0  }
   0x6 LB: > { %s2816_s22 = sadd.s32 4294967295, %s2748_s21   ;;  %s2282_s23 = sadd.s32 4294967294, %s2748_s21   ;;  %s2748_s21 = sphi %s2801_s21, %s3409_s21   ;;  %s2744_s20 = sphi %s2799_s20, %s3408_s20   ;;  %s2740_s19 = sphi %s2797_s19, %s3407_s19   ;;  %s2736_s18 = sphi %s2795_s18, %s3406_s18  }
   0x7   : > { %p42_p0 = scmp.ne.s32.totalorder %s2740_s19, %s2736_s18  ;;  %p3390_p1 = scmp.eq.s32.totalorder %s2816_s22, 0 }
   0x8   : > { %p156_p3 = scmp.eq.s32.totalorder %s2282_s23, 1  ;;  %p2283_p5 = scmp.ge.s32.totalorder %s2748_s21, 1 }
   0x9   : > { %p2825_p4 = por %p3390_p1, %p42_p0  ;;  %p163_p7 = scmp.lt.s32.totalorder %s2748_s21, 3 }
   0xa   : > { %p2830_p6 = por %p156_p3, %p42_p0  ;;  %s2750_s27 = smov [#allocation5]  }
   0xb   : > { %s3393_s24 = scalar_select %p2825_p4, 1, 0 }
   0xc   : > { %s3394_s25 = scalar_select %p2830_p6, 1, 0 }
   0xd   : > { %p2835_p8 = pnand %p2283_p5, %p163_p7  ;;  %s175_s28 = sshll.u32 %s2750_s27, 4  ;;  %s2839_s28 = int_to_ptr.vmem [resolvable:$true] %s175_s28 }
   0xe   : > { %s2751_s30 = smov [#allocation7]   ;;  %s2592_s9 = scalar_lea.hbm %s3385_s1, 6144 }
   0xf   : > { %p2479_p9 = pneg %p2835_p8  ;;  %s191_s6 = sshll.u32 %s2751_s30, 4  ;;  %s2850_s6 = int_to_ptr.vmem [resolvable:$true] %s191_s6 }
  0x10   : > { %p2593_p12 = scmp.ne.s32.totalorder %s3385_s1, %s2592_s9  ;;  %p2599_p5 = scmp.lt.u32.totalorder %s2592_s9, %s3385_s1 }
  0x11   : > { %p2846_p11 = pnand %p2479_p9, %p3390_p1 }
  0x13   : > { %p2594_p13 = pneg %p2846_p11 }
  0x15   : > { %p2595_p0 = pnand %p2594_p13, %p2593_p12 }
  0x17   : > { %p2596_p3 = pneg %p2595_p0 }
  0x19   : > { %p2601_p7 = pnand %p2599_p5, %p2596_p3 }
  0x1b   : > { %2604 = shalt.err (!%p2601_p7)
}
  0x1c   : > { %s2605_s14 = scalar_lea.vmem %s2839_s28, 6144  ;;  %p2613_p2 = scmp.lt.s32.totalorder %s2839_s28, %s2839_s28 }
  0x1d   : > { %p2606_p9 = scmp.ne.s32.totalorder %s2839_s28, %s2605_s14  ;;  %p2614_p12 = scmp.lt.s32.totalorder %s2605_s14, %s2605_s14 }
  0x1f   : > { %p2608_p10 = pnand %p2606_p9, %p2594_p13  ;;  %p2615_p0 = por %p2614_p12, %p2613_p2 }
  0x21   : > { %p2609_p1 = pneg %p2608_p10 }
  0x23   : > { %p2616_p6 = pnand %p2615_p0, %p2609_p1 }
  0x25   : > { %2619 = shalt.err (!%p2616_p6)
}
  0x26   : > { %s2752_s15 = smov 128   ;;  %s2753_s16 = smov 8  }
  0x27   : > { %2482 = dma.hbm_to_vmem [thread:$0]  (!%p2846_p11), %s3385_s1, 6144, %s2839_s28, [#allocation6], %s2752_s15, %s2752_s15, %s2753_s16  }
  0x28   : > { %s2620_s7 = scalar_lea.hbm %s3387_s3, 2048 }
  0x29   : > { %p2621_p1 = scmp.ne.s32.totalorder %s3387_s3, %s2620_s7  ;;  %p2627_p10 = scmp.lt.u32.totalorder %s2620_s7, %s3387_s3 }
  0x2b   : > { %p2623_p2 = pnand %p2621_p1, %p2594_p13 }
  0x2d   : > { %p2624_p6 = pneg %p2623_p2 }
  0x2f   : > { %p2629_p3 = pnand %p2627_p10, %p2624_p6 }
  0x31   : > { %2632 = shalt.err (!%p2629_p3)
}
  0x32   : > { %s2633_s28 = scalar_lea.vmem %s2850_s6, 2048  ;;  %p2641_p12 = scmp.lt.s32.totalorder %s2850_s6, %s2850_s6 }
  0x33   : > { %p2634_p5 = scmp.ne.s32.totalorder %s2850_s6, %s2633_s28  ;;  %p2642_p0 = scmp.lt.s32.totalorder %s2633_s28, %s2633_s28 }
  0x35   : > { %p2636_p7 = pnand %p2634_p5, %p2594_p13  ;;  %p2643_p1 = por %p2642_p0, %p2641_p12 }
  0x37   : > { %p2637_p9 = pneg %p2636_p7 }
  0x39   : > { %p2644_p2 = pnand %p2643_p1, %p2637_p9 }
  0x3b   : > { %2647 = shalt.err (!%p2644_p2)
}
  0x3c   : > { %2485 = dma.hbm_to_vmem [thread:$0]  (!%p2846_p11), %s3387_s3, 2048, %s2850_s6, [#allocation6], %s2752_s15, %s2752_s15, %s2753_s16  }
  0x3d   : > { %s2911_s29 = sadd.s32 1, %s2748_s21   ;;  %s29_s14 = sadd.s32 1, %s2744_s20 }
  0x3e   : > { %s26_s17 = ssub.s32 %s2748_s21, %s2911_s29  ;;  %p36_p13 = scmp.ne.s32.totalorder %s2744_s20, %s2740_s19 }
  0x3f   : > { %p27_p6 = scmp.eq.s32.totalorder %s26_s17, 0  ;;  %p37_p10 = scmp.eq.s32.totalorder %s2748_s21, 0 }
  0x40   : > { %p3397_p3 = scmp.eq.s32.totalorder %s2816_s22, 1  ;;  %p2496_p7 = scmp.lt.s32.totalorder %s2748_s21, 2 }
  0x41   : > { %s2927_s27 = scalar_select %p27_p6, %s2744_s20, %s29_s14  }
  0x42   : > { %p2921_p5 = por %p3397_p3, %p36_p13  ;;  %p38_p9 = por %p37_p10, %p36_p13 }
  0x43   : > { %s208_s30 = sand.u32 1, %s2744_s20   ;;  %s2325_s6 = sshll.u32 %s2748_s21, 8 }
  0x44   : > { %s3398_s23 = scalar_select %p2921_p5, 1, 0 }
  0x45   : > { %s2287_s7 = sshll.u32 %s208_s30, 4  ;;  %s2934_s10 = scalar_lea.hbm %s3384_s0, %s2325_s6 }
  0x46   : > { %s212_s11 = scalar_lea.vmem [#allocation2], %s2287_s7  ;;  %p2938_p11 = pnand %p2496_p7, %p38_p9 }
  0x47   : > { %s219_s28 = sshll.u32 %s212_s11, 4  ;;  %s2942_s13 = scalar_lea.sflag [#allocation3], %s208_s30  ;;  %s2936_s28 = int_to_ptr.vmem [resolvable:$true] %s219_s28 }
  0x48   : > { %s2648_s14 = scalar_lea.hbm %s2934_s10, 256  ;;  %p2650_p0 = pneg %p2938_p11 }
  0x49   : > { %p2649_p12 = scmp.ne.s32.totalorder %s2934_s10, %s2648_s14  ;;  %s2653_s6 = scalar_lea.hbm %s3384_s0, 512 }
  0x4a   : > { %p2654_p13 = scmp.lt.u32.totalorder %s2934_s10, %s3384_s0  ;;  %p2655_p6 = scmp.lt.u32.totalorder %s2653_s6, %s2648_s14 }
  0x4b   : > { %p2651_p1 = pnand %p2650_p0, %p2649_p12  ;;  %p2657_p3 = scmp.lt.u32.totalorder %s2648_s14, %s2934_s10 }
  0x4c   : > { %p2656_p10 = por %p2655_p6, %p2654_p13 }
  0x4d   : > { %p2652_p2 = pneg %p2651_p1 }
  0x4e   : > { %p2658_p7 = por %p2657_p3, %p2656_p10 }
  0x50   : > { %p2659_p9 = pnand %p2658_p7, %p2652_p2 }
  0x52   : > { %2662 = shalt.err (!%p2659_p9)
}
  0x53   : > { %s2663_s30 = scalar_lea.vmem %s2936_s28, 256  ;;  %s2754_s11 = smov [#allocation2]  }
  0x54   : > { %p2664_p12 = scmp.ne.s32.totalorder %s2936_s28, %s2663_s30  ;;  %s2668_s17 = sshll.u32 %s2754_s11, 4  ;;  %s2669_s17 = int_to_ptr.vmem [resolvable:$false] %s2668_s17 }
  0x55   : > { %s2670_s7 = scalar_lea.vmem %s2669_s17, 512  ;;  %p2671_p4 = scmp.lt.s32.totalorder %s2936_s28, %s2669_s17 }
  0x56   : > { %p2666_p1 = pnand %p2664_p12, %p2650_p0  ;;  %p2672_p13 = scmp.lt.s32.totalorder %s2670_s7, %s2663_s30 }
  0x58   : > { %p2667_p5 = pneg %p2666_p1  ;;  %p2673_p6 = por %p2672_p13, %p2671_p4 }
  0x5a   : > { %p2674_p10 = pnand %p2673_p6, %p2667_p5 }
  0x5c   : > { %2677 = shalt.err (!%p2674_p10)
}
  0x5d   : > { %2489 = dma.hbm_to_vmem [thread:$0]  (!%p2938_p11), %s2934_s10, 256, %s2936_s28, %s2942_s13, %s2752_s15, %s2752_s15, %s2753_s16  }
  0x5e   : > { %231 = sbr.rel (%p2835_p8) target bundleno = 1740 (0x6cc), region = 40  ;;  %s2976_s14 = sand.u32 (!%p2835_p8), 1, %s2740_s19  }
  0x5f   : > { %s2291_s6 = sshll.u32 (!%p2835_p8), %s2976_s14, 4  ;;  %s234_s8 = scalar_lea.sflag (!%p2835_p8), [#allocation3], %s2976_s14 }
  0x60   : > { %s237_s12 = scalar_lea.vmem (!%p2835_p8), [#allocation2], %s2291_s6  ;;  %p3400_p4 = scmp.ne.s32.totalorder (!%p2835_p8), %s3393_s24, 0 }
  0x65   : > { %2723 = dma.done.wait (%p3400_p4), %s234_s8, 256  }
  0x66   : > { %2725 = vsyncadd (%p3400_p4), %s234_s8, 4294967040  ;;  %p3401_p5 = scmp.eq.s32.totalorder %s2816_s22, 0 }
  0x68   : > { %2727 = dma.done.wait (%p3401_p5), [#allocation6], 8192   ;;  %p3402_p8 = pmov %p3401_p5 }
  0x69   : > { %v292_v0 = vld [vmem:[#allocation5 + $0x80] sm:$0xff]  ;;  %v293_v1 = vld [vmem:[#allocation5 + $0x88] sm:$0xff]  ;;  %v294_v5 = vld [vmem:[#allocation5 + $0x90] sm:$0xff]  ;;  %v2755_v53 = vmov 0.0   ;;  %vm2756_vm0 = vmmov 0   ;;  %s2757_s15 = smov 64  }
  0x6a   : > { %2729 = vsyncadd (%p3402_p8), [#allocation6], 4294959104  ;;  %v276_v2 = vld [vmem:[#allocation5] sm:$0xff]  ;;  %v332_v3 = vpack.c.bf16 %v293_v1, %v292_v0  ;;  %v277_v4 = vld [vmem:[#allocation5 + $0x8] sm:$0xff]  ;;  %2379 = vmatprep.subr.bf16.mxu1 %v2755_v53  ;;  %2395 = vmatprep.mubr.msk.bf16.mxu1 %vm2756_vm0, %v2755_v53  ;;  %s2758_s16 = smov 96   ;;  %s2759_s10 = smov 32  }
  0x6b   : > { %v295_v6 = vld [vmem:[#allocation5 + $0x98] sm:$0xff]  ;;  %v324_v7 = vpack.c.bf16 %v277_v4, %v276_v2  ;;  %v278_v9 = vld [vmem:[#allocation5 + $0x10] sm:$0xff]  ;;  %v296_v11 = vld [vmem:[#allocation5 + $0xa0] sm:$0xff]  ;;  %vm1360_vm1 = vcmask 261120   ;;  %vm1549_vm2 = vcmask 130048   ;;  %vm2120_vm3 = vcmask 523264  }
  0x6c   : > { %v333_v8 = vpack.c.bf16 %v295_v6, %v294_v5  ;;  %2327 = vmatprep.subr.bf16.mxu0 %v332_v3  ;;  %v279_v10 = vld [vmem:[#allocation5 + $0x18] sm:$0xff]  ;;  %v297_v12 = vld [vmem:[#allocation5 + $0xa8] sm:$0xff]  ;;  %v273_v15 = vld [vmem:[%s237_s12] sm:$0xff]  ;;  %vm2123_vm4 = vcmask 785408   ;;  %s271_s9 = scalar_lea.vmem [#allocation8], %s2291_s6  ;;  %s2326_s11 = sshll.u32 %s2816_s22, 8 }
  0x6d   : > { %2328 = vmatpush3.bf16.xpose.msra.mxu0 %v324_v7  ;;  %v325_v13 = vpack.c.bf16 %v279_v10, %v278_v9  ;;  %v334_v14 = vpack.c.bf16 %v297_v12, %v296_v11  ;;  %v274_v16 = vld [vmem:[%s237_s12 + $0x8] sm:$0xff]  ;;  %v280_v18 = vld [vmem:[#allocation5 + $0x20] sm:$0xff]  ;;  %v298_v20 = vld [vmem:[#allocation5 + $0xb0] sm:$0xff]  ;;  %v375_v12 = vlaneseq  ;;  %s2190_s30 = sshll.u32 %s271_s9, 4  ;;  %s3340_s8 = scalar_lea.hbm %s3389_s5, %s2326_s11  ;;  %s3335_s30 = int_to_ptr.vmem [resolvable:$true] %s2190_s30 }
  0x6e   : > { %2329 = vmatprep.subr.bf16.mxu0 %v333_v8  ;;  %v2990_v17 = vpack.c.bf16 %v274_v16, %v273_v15  ;;  %v281_v19 = vld [vmem:[#allocation5 + $0x28] sm:$0xff]  ;;  %v299_v21 = vld [vmem:[#allocation5 + $0xb8] sm:$0xff]  ;;  %v282_v24 = vld [vmem:[#allocation5 + $0x30] sm:$0xff]  ;;  %s2177_s6 = scalar_lea.sflag [#allocation4], %s2976_s14  ;;  %s2678_s22 = scalar_lea.vmem %s3335_s30, 256 }
  0x6f   : > { %v326_v22 = vpack.c.bf16 %v281_v19, %v280_v18  ;;  %v335_v23 = vpack.c.bf16 %v299_v21, %v298_v20  ;;  %v283_v25 = vld [vmem:[#allocation5 + $0x38] sm:$0xff]  ;;  %v300_v26 = vld [vmem:[#allocation5 + $0xc0] sm:$0xff]  ;;  %v301_v27 = vld [vmem:[#allocation5 + $0xc8] sm:$0xff]  ;;  %p2679_p11 = scmp.ne.s32.totalorder %s3335_s30, %s2678_s22  ;;  %p3403_p0 = scmp.ne.s32.totalorder %s3398_s23, 0 }
  0x70   : > { %2343 = vmatprep.mubr.bf16.mxu0 %v2990_v17  ;;  %v327_v28 = vpack.c.bf16 %v283_v25, %v282_v24  ;;  %v336_v29 = vpack.c.bf16 %v301_v27, %v300_v26  ;;  %v284_v30 = vld [vmem:[#allocation5 + $0x40] sm:$0xff]  ;;  %v285_v31 = vld [vmem:[#allocation5 + $0x48] sm:$0xff]  ;;  %v302_v32 = vld [vmem:[#allocation5 + $0xd0] sm:$0xff]  ;;  %s2762_s12 = smov [#allocation8]  }
  0x71   : > { %v303_v33 = vld [vmem:[#allocation5 + $0xd8] sm:$0xff]  ;;  %v328_v34 = vpack.c.bf16 %v285_v31, %v284_v30  ;;  %v286_v36 = vld [vmem:[#allocation5 + $0x50] sm:$0xff]  ;;  %v304_v38 = vld [vmem:[#allocation5 + $0xe0] sm:$0xff]  ;;  %v2761_v31 = vmov 1934713408   ;;  %p2680_p2 = pnand %p2679_p11, %p3403_p0  ;;  %s2682_s24 = sshll.u32 %s2762_s12, 4  ;;  %s2683_s24 = int_to_ptr.vmem [resolvable:$false] %s2682_s24 }
  0x72   : > { %v337_v35 = vpack.c.bf16 %v303_v33, %v302_v32  ;;  %v287_v37 = vld [vmem:[#allocation5 + $0x58] sm:$0xff]  ;;  %v305_v39 = vld [vmem:[#allocation5 + $0xe8] sm:$0xff]  ;;  %v288_v42 = vld [vmem:[#allocation5 + $0x60] sm:$0xff]  ;;  %v531_v32 = vunpack.c.l.s4 %v2761_v31  ;;  %s2684_s26 = scalar_lea.vmem %s2683_s24, 512  ;;  %p2685_p7 = scmp.lt.s32.totalorder %s3335_s30, %s2683_s24 }
  0x73   : > { %v329_v40 = vpack.c.bf16 %v287_v37, %v286_v36  ;;  %v338_v41 = vpack.c.bf16 %v305_v39, %v304_v38  ;;  %v289_v43 = vld [vmem:[#allocation5 + $0x68] sm:$0xff]  ;;  %v306_v44 = vld [vmem:[#allocation5 + $0xf0] sm:$0xff]  ;;  %v307_v45 = vld [vmem:[#allocation5 + $0xf8] sm:$0xff]  ;;  %p2681_p3 = pneg %p2680_p2  ;;  %p2686_p9 = scmp.lt.s32.totalorder %s2684_s26, %s2678_s22 }
  0x74   : > { %v330_v46 = vpack.c.bf16 %v289_v43, %v288_v42  ;;  %v339_v47 = vpack.c.bf16 %v307_v45, %v306_v44  ;;  %v290_v48 = vld [vmem:[#allocation5 + $0x70] sm:$0xff]  ;;  %v291_v49 = vld [vmem:[#allocation5 + $0x78] sm:$0xff]  ;;  %v308_v51 = vld [vmem:[#allocation5 + $0x100] sm:$0xff]  ;;  %v532_v36 = vunpack.c.0.s8 %v531_v32 }
  0x75   : > { %2330 = vmatpush3.bf16.xpose.msra.mxu0 %v325_v13  ;;  %v331_v50 = vpack.c.bf16 %v291_v49, %v290_v48  ;;  %v309_v52 = vld [vmem:[#allocation5 + $0x108] sm:$0xff]  ;;  %v310_v55 = vld [vmem:[#allocation5 + $0x110] sm:$0xff]  ;;  %v311_v56 = vld [vmem:[#allocation5 + $0x118] sm:$0xff]  ;;  %v3004_v13 = vshrl.u32 %v375_v12, 7  ;;  %p2687_p12 = por %p2686_p9, %p2685_p7 }
  0x76   : > { %2331 = vmatprep.subr.bf16.mxu0 %v334_v14  ;;  %v340_v54 = vpack.c.bf16 %v309_v52, %v308_v51  ;;  %v341_v57 = vpack.c.bf16 %v311_v56, %v310_v55  ;;  %v312_v58 = vld [vmem:[#allocation5 + $0x120] sm:$0xff]  ;;  %v313_v59 = vld [vmem:[#allocation5 + $0x128] sm:$0xff]  ;;  %v314_v61 = vld [vmem:[#allocation5 + $0x130] sm:$0xff] }
  0x77   : > { %v342_v60 = vpack.c.bf16 %v313_v59, %v312_v58  ;;  %v315_v62 = vld [vmem:[#allocation5 + $0x138] sm:$0xff]  ;;  %v316_v0 = vld [vmem:[#allocation5 + $0x140] sm:$0xff]  ;;  %v317_v1 = vld [vmem:[#allocation5 + $0x148] sm:$0xff]  ;;  %v381_v14 = vsub.s32 1, %v3004_v13  ;;  %v377_v16 = vsub.s32 0, %v3004_v13  ;;  %v3048_v44 = vsub.s32 %v532_v36, %v3004_v13  ;;  %p2688_p1 = pnand %p2687_p12, %p2681_p3 }
  0x78   : > { %2380 = vmatpush3.bf16.xpose.msra.mxu1 %v340_v54  ;;  %v343_v63 = vpack.c.bf16 %v315_v62, %v314_v61  ;;  %v344_v2 = vpack.c.bf16 %v317_v1, %v316_v0  ;;  %v318_v3 = vld [vmem:[#allocation5 + $0x150] sm:$0xff]  ;;  %v319_v4 = vld [vmem:[#allocation5 + $0x158] sm:$0xff]  ;;  %v320_v6 = vld [vmem:[#allocation5 + $0x160] sm:$0xff] }
  0x79   : > { %2381 = vmatprep.subr.bf16.mxu1 %v2755_v53  ;;  %v345_v5 = vpack.c.bf16 %v319_v4, %v318_v3  ;;  %v321_v7 = vld [vmem:[#allocation5 + $0x168] sm:$0xff]  ;;  %v322_v9 = vld [vmem:[#allocation5 + $0x170] sm:$0xff]  ;;  %v323_v10 = vld [vmem:[#allocation5 + $0x178] sm:$0xff] }
  0x7a   : > { %v346_v8 = vpack.c.bf16 %v321_v7, %v320_v6  ;;  %v347_v11 = vpack.c.bf16 %v323_v10, %v322_v9  ;;  %v3017_v15 = vld [vmem:[%s3386_s2] sm:$0x7] }
  0x7b   : > { %v382_v18 = vrot.slane %v3017_v15, %v381_v14  ;;  %v378_v21 = vrot.slane %v3017_v15, %v377_v16 }
  0x7d   : > { %2332 = vmatpush3.bf16.xpose.msra.mxu0 %v326_v22 }
  0x7e   : > { %2333 = vmatprep.subr.bf16.mxu0 %v335_v23 }
  0x80   : > { %2382 = vmatpush3.bf16.xpose.msra.mxu1 %v341_v57 }
  0x81   : > { %2383 = vmatprep.subr.bf16.mxu1 %v2755_v53 }
  0x85   : > { %2334 = vmatpush3.bf16.xpose.msra.mxu0 %v327_v28 }
  0x86   : > { %2335 = vmatprep.subr.bf16.mxu0 %v336_v29  ;;  %v2760_v29 = vmov 1983009808  }
  0x87   : > { %v499_v30 = vunpack.c.l.s4 %v2760_v29 }
  0x88   : > { %2384 = vmatpush3.bf16.xpose.msra.mxu1 %v342_v60 }
  0x89   : > { %2385 = vmatprep.subr.bf16.mxu1 %v2755_v53  ;;  %v500_v33 = vunpack.c.0.s8 %v499_v30 }
  0x8b   : > { %v3045_v37 = vsub.s32 %v500_v33, %v3004_v13 }
  0x8d   : > { %2336 = vmatpush3.bf16.xpose.msra.mxu0 %v328_v34 }
  0x8e   : > { %2337 = vmatprep.subr.bf16.mxu0 %v337_v35 }
  0x90   : > { %2386 = vmatpush3.bf16.xpose.msra.mxu1 %v343_v63 }
  0x91   : > { %2387 = vmatprep.subr.bf16.mxu1 %v2755_v53 }
  0x95   : > { %2338 = vmatpush3.bf16.xpose.msra.mxu0 %v329_v40 }
  0x96   : > { %2339 = vmatprep.subr.bf16.mxu0 %v338_v41 }
  0x98   : > { %2388 = vmatpush3.bf16.xpose.msra.mxu1 %v344_v2 }
  0x99   : > { %2389 = vmatprep.subr.bf16.mxu1 %v2755_v53 }
  0x9d   : > { %2340 = vmatpush3.bf16.xpose.msra.mxu0 %v330_v46 }
  0x9e   : > { %2341 = vmatprep.subr.bf16.mxu0 %v339_v47 }
  0xa0   : > { %2390 = vmatpush3.bf16.xpose.msra.mxu1 %v345_v5 }
  0xa1   : > { %2391 = vmatprep.subr.bf16.mxu1 %v2755_v53 }
  0xa5   : > { %2342 = vmatpush3.bf16.xpose.msra.mxu0 %v331_v50 }
  0xa6   : > { %2447 = vmatprep.subr.bf16.mxu0 %v2755_v53 }
  0xa8   : > { %2392 = vmatpush3.bf16.xpose.msra.mxu1 %v346_v8 }
  0xa9   : > { %2393 = vmatprep.subr.bf16.mxu1 %v2755_v53 }
  0xac   : > { %2344 = vmatmul.mubr.bf16.vlgmr.msra.gmra.mrb[0].mxu0 %v2990_v17 }
  0xad   : > { %2463 = vmatprep.mubr.msk.bf16.mxu0 %vm2756_vm0, %v2755_v53 }
  0xb0   : > { %2394 = vmatpush3.bf16.xpose.msra.mxu1 %v347_v11 }
  0xb1   : > { %2399 = vmatprep.subr.bf16.mxu1 %v2755_v53 }
  0xb7   : > { %2396 = vmatmul.mubr.bf16.vlgmr.msra.gmra.mrb[0].mxu1 %v2990_v17 }
  0xb8   : > { %2401 = vmatprep.mubr.msk.bf16.mxu1 %vm2756_vm0, %v2755_v53 }
 0x17f   : > { %v424_v19 = vpop.f32.mrb[0].mxu0 }
 0x180   : > { %v426_v20 = vpop.f32.mrb[1].mxu0  ;;  %v425_v24 = vadd.f32 %v424_v19, %v378_v21 }
 0x181   : > { %v427_v22 = vadd.f32 %v426_v20, %v382_v18  ;;  %v428_v17 = vpop.f32.mrb[2].mxu0 }
 0x182   : > { %v430_v23 = vpop.f32.mrb[3].mxu0  ;;  %v3026_v26 = vmul.f32 0.17677669, %v425_v24  ;;  %v429_v27 = vadd.f32 %v428_v17, %v378_v21 }
 0x183   : > { %776 = vrot.lane.b32.xlu1 %v427_v22, %s2757_s15  ;;  %770 = vrot.lane.b32.xlu0 %v427_v22, %s2758_s16  ;;  %v431_v25 = vadd.f32 %v430_v23, %v382_v18 }
 0x184   : > { %v3031_v28 = vmul.f32 0.17677669, %v429_v27 }
 0x187   : > { %778 = vrot.lane.b32.xlu1 %v431_v25, %s2757_s15  ;;  %782 = vrot.lane.b32.xlu0 %v427_v22, %s2759_s10 }
 0x18b   : > { %784 = vrot.lane.b32.xlu1 %v431_v25, %s2759_s10  ;;  %478 = vrot.lane.b32.xlu0 %v3026_v26, %s2758_s16 }
 0x18f   : > { %480 = vrot.lane.b32.xlu1 %v3031_v28, %s2758_s16  ;;  %772 = vrot.lane.b32.xlu0 %v431_v25, %s2758_s16 }
 0x193   : > { %486 = vrot.lane.b32.xlu1 %v3031_v28, %s2757_s15  ;;  %484 = vrot.lane.b32.xlu0 %v3026_v26, %s2757_s15 }
 0x197   : > { %492 = vrot.lane.b32.xlu1 %v3031_v28, %s2759_s10  ;;  %490 = vrot.lane.b32.xlu0 %v3026_v26, %s2759_s10 }
 0x1f5   : > { %v777_v34 = vpop.permute.xlu1 %776  ;;  %v771_v35 = vpop.permute.xlu0 %770 }
 0x1f6   : > { %v788_v38 = vcombine.low %v427_v22, %v777_v34  ;;  %v789_v39 = vcombine.high %v427_v22, %v777_v34 }
 0x1f8   : > { %v796_v45 = vrot.slane %v788_v38, %v3045_v37  ;;  %v803_v46 = vrot.slane %v789_v39, %v3045_v37 }
 0x1f9   : > { %v779_v40 = vpop.permute.xlu1 %778  ;;  %v783_v41 = vpop.permute.xlu0 %782 }
 0x1fa   : > { %v804_v42 = vcombine.low %v771_v35, %v783_v41  ;;  %v805_v43 = vcombine.high %v771_v35, %v783_v41  ;;  %v856_v60 = vcombine.low %v431_v25, %v779_v40  ;;  %v857_v61 = vcombine.high %v431_v25, %v779_v40 }
 0x1fc   : > { %v812_v47 = vrot.slane %v804_v42, %v3045_v37  ;;  %v819_v48 = vrot.slane %v805_v43, %v3045_v37  ;;  %v864_v6 = vrot.slane %v856_v60, %v3045_v37  ;;  %v871_v7 = vrot.slane %v857_v61, %v3045_v37 }
 0x1fd   : > { %v785_v49 = vpop.permute.xlu1 %784  ;;  %v479_v50 = vpop.permute.xlu0 %478 }
 0x1fe   : > { %v820_v51 = vcombine.low %v796_v45, %v812_v47  ;;  %v821_v52 = vcombine.high %v796_v45, %v812_v47  ;;  %v836_v54 = vcombine.low %v803_v46, %v819_v48  ;;  %v837_v55 = vcombine.high %v803_v46, %v819_v48 }
 0x200   : > { %v828_v56 = vrot.slane %v820_v51, %v3048_v44  ;;  %v835_v57 = vrot.slane %v821_v52, %v3048_v44  ;;  %v844_v58 = vrot.slane %v836_v54, %v3048_v44  ;;  %v851_v59 = vrot.slane %v837_v55, %v3048_v44 }
 0x201   : > { %v481_v62 = vpop.permute.xlu1 %480  ;;  %v773_v63 = vpop.permute.xlu0 %772 }
 0x202   : > { %v872_v0 = vcombine.low %v773_v63, %v785_v49  ;;  %v873_v1 = vcombine.high %v773_v63, %v785_v49  ;;  %v924_v2 = vcombine.low %v828_v56, %v835_v57  ;;  %v2299_v3 = vcombine.high %v828_v56, %v835_v57 }
 0x203   : > { %v940_v4 = vcombine.low %v844_v58, %v851_v59  ;;  %v2300_v5 = vcombine.high %v844_v58, %v851_v59 }
 0x204   : > { %v880_v8 = vrot.slane %v872_v0, %v3045_v37  ;;  %v887_v9 = vrot.slane %v873_v1, %v3045_v37  ;;  %v3067_v17 = vrot.slane %v924_v2, %v3045_v37  ;;  %v3070_v23 = vrot.slane %v2299_v3, %v3045_v37 }
 0x205   : > { %v487_v10 = vpop.permute.xlu1 %486  ;;  %v485_v11 = vpop.permute.xlu0 %484  ;;  %v3073_v24 = vrot.slane %v940_v4, %v3045_v37  ;;  %v3076_v25 = vrot.slane %v2300_v5, %v3045_v37 }
 0x206   : > { %v564_v12 = vcombine.low %v3031_v28, %v487_v10  ;;  %v565_v14 = vcombine.high %v3031_v28, %v487_v10  ;;  %v496_v16 = vcombine.low %v3026_v26, %v485_v11  ;;  %v497_v18 = vcombine.high %v3026_v26, %v485_v11 }
 0x207   : > { %v888_v19 = vcombine.low %v864_v6, %v880_v8  ;;  %v889_v20 = vcombine.high %v864_v6, %v880_v8  ;;  %v904_v21 = vcombine.low %v871_v7, %v887_v9  ;;  %v905_v22 = vcombine.high %v871_v7, %v887_v9 }
 0x208   : > { %v572_v36 = vrot.slane %v564_v12, %v3045_v37  ;;  %v579_v38 = vrot.slane %v565_v14, %v3045_v37  ;;  %v504_v39 = vrot.slane %v496_v16, %v3045_v37  ;;  %v511_v40 = vrot.slane %v497_v18, %v3045_v37 }
 0x209   : > { %v896_v27 = vrot.slane %v888_v19, %v3048_v44  ;;  %v903_v26 = vrot.slane %v889_v20, %v3048_v44  ;;  %v912_v28 = vrot.slane %v904_v21, %v3048_v44  ;;  %v919_v29 = vrot.slane %v905_v22, %v3048_v44  ;;  %v493_v30 = vpop.permute.xlu1 %492  ;;  %v491_v31 = vpop.permute.xlu0 %490 }
 0x20a   : > { %v580_v32 = vcombine.low %v481_v62, %v493_v30  ;;  %v581_v33 = vcombine.high %v481_v62, %v493_v30  ;;  %v512_v34 = vcombine.low %v479_v50, %v491_v31  ;;  %v513_v35 = vcombine.high %v479_v50, %v491_v31 }
 0x20b   : > { %v992_v46 = vcombine.low %v896_v27, %v903_v26  ;;  %v2301_v47 = vcombine.high %v896_v27, %v903_v26  ;;  %v1008_v48 = vcombine.low %v912_v28, %v919_v29  ;;  %v2302_v49 = vcombine.high %v912_v28, %v919_v29 }
 0x20c   : > { %v588_v41 = vrot.slane %v580_v32, %v3045_v37  ;;  %v595_v42 = vrot.slane %v581_v33, %v3045_v37  ;;  %v520_v43 = vrot.slane %v512_v34, %v3045_v37  ;;  %v527_v45 = vrot.slane %v513_v35, %v3045_v37 }
 0x20d   : > { %v999_v22 = vrot.slane %v992_v46, %v3045_v37  ;;  %v1007_v27 = vrot.slane %v2301_v47, %v3045_v37  ;;  %v1015_v26 = vrot.slane %v1008_v48, %v3045_v37  ;;  %v1023_v28 = vrot.slane %v2302_v49, %v3045_v37 }
 0x20e   : > { %v596_v50 = vcombine.low %v572_v36, %v588_v41  ;;  %v597_v51 = vcombine.high %v572_v36, %v588_v41  ;;  %v612_v52 = vcombine.low %v579_v38, %v595_v42  ;;  %v613_v54 = vcombine.high %v579_v38, %v595_v42 }
 0x20f   : > { %v528_v55 = vcombine.low %v504_v39, %v520_v43  ;;  %v529_v56 = vcombine.high %v504_v39, %v520_v43  ;;  %v544_v57 = vcombine.low %v511_v40, %v527_v45  ;;  %v545_v58 = vcombine.high %v511_v40, %v527_v45 }
 0x210   : > { %v604_v59 = vrot.slane %v596_v50, %v3048_v44  ;;  %v611_v60 = vrot.slane %v597_v51, %v3048_v44  ;;  %v620_v61 = vrot.slane %v612_v52, %v3048_v44  ;;  %v627_v62 = vrot.slane %v613_v54, %v3048_v44 }
 0x211   : > { %v536_v63 = vrot.slane %v528_v55, %v3048_v44  ;;  %v543_v0 = vrot.slane %v529_v56, %v3048_v44  ;;  %v552_v1 = vrot.slane %v544_v57, %v3048_v44  ;;  %v559_v2 = vrot.slane %v545_v58, %v3048_v44 }
 0x212   : > { %v700_v3 = vcombine.low %v604_v59, %v611_v60  ;;  %v2297_v4 = vcombine.high %v604_v59, %v611_v60  ;;  %v716_v5 = vcombine.low %v620_v61, %v627_v62  ;;  %v2298_v6 = vcombine.high %v620_v61, %v627_v62 }
 0x213   : > { %v632_v7 = vcombine.low %v536_v63, %v543_v0  ;;  %v2295_v8 = vcombine.high %v536_v63, %v543_v0  ;;  %v648_v9 = vcombine.low %v552_v1, %v559_v2  ;;  %v2296_v10 = vcombine.high %v552_v1, %v559_v2 }
 0x214   : > { %v3099_v11 = vrot.slane %v700_v3, %v3045_v37  ;;  %v3102_v12 = vrot.slane %v2297_v4, %v3045_v37  ;;  %v3105_v14 = vrot.slane %v716_v5, %v3045_v37  ;;  %v731_v16 = vrot.slane %v2298_v6, %v3045_v37 }
 0x215   : > { %v639_v18 = vrot.slane %v632_v7, %v3045_v37  ;;  %v647_v19 = vrot.slane %v2295_v8, %v3045_v37  ;;  %v655_v20 = vrot.slane %v648_v9, %v3045_v37  ;;  %v663_v21 = vrot.slane %v2296_v10, %v3045_v37 }
 0x216   : > { %v732_v29 = vcombine.low %v3099_v11, %v3102_v12  ;;  %v748_v30 = vcombine.low %v3105_v14, %v731_v16  ;;  %v956_v33 = vcombine.low %v3067_v17, %v3070_v23  ;;  %v972_v34 = vcombine.low %v3073_v24, %v3076_v25 }
 0x217   : > { %v664_v31 = vcombine.low %v639_v18, %v647_v19  ;;  %v680_v32 = vcombine.low %v655_v20, %v663_v21  ;;  %v1024_v35 = vcombine.low %v999_v22, %v1007_v27  ;;  %v1040_v36 = vcombine.low %v1015_v26, %v1023_v28 }
 0x218   : > { %v964_v38 = vrot.slane %v956_v33, %v3048_v44  ;;  %v980_v39 = vrot.slane %v972_v34, %v3048_v44  ;;  %v740_v42 = vrot.slane %v732_v29, %v3048_v44  ;;  %v756_v43 = vrot.slane %v748_v30, %v3048_v44 }
 0x219   : > { %v1032_v40 = vrot.slane %v1024_v35, %v3048_v44  ;;  %v1048_v41 = vrot.slane %v1040_v36, %v3048_v44  ;;  %v672_v45 = vrot.slane %v664_v31, %v3048_v44  ;;  %v688_v46 = vrot.slane %v680_v32, %v3048_v44  ;;  %v467_v32 = vpop.f32.mrb[0].mxu1 }
 0x21a   : > { %v988_v47 = vcombine.low %v964_v38, %v980_v39  ;;  %v764_v51 = vcombine.low %v740_v42, %v756_v43  ;;  %v1025_v55 = vcombine.high %v999_v22, %v1007_v27  ;;  %v1041_v56 = vcombine.high %v1015_v26, %v1023_v28  ;;  %v2397_v34 = vpop.f32.mrb[1].mxu1 }
 0x21b   : > { %v1056_v48 = vcombine.low %v1032_v40, %v1048_v41  ;;  %v696_v50 = vcombine.low %v672_v45, %v688_v46  ;;  %v1057_v54 = vcombine.high %v1032_v40, %v1048_v41  ;;  %v989_v57 = vcombine.high %v964_v38, %v980_v39  ;;  %v470_v35 = vpop.f32.mrb[2].mxu1 }
 0x21c   : > { %v957_v58 = vcombine.high %v3067_v17, %v3070_v23  ;;  %v973_v59 = vcombine.high %v3073_v24, %v3076_v25  ;;  %v1039_v62 = vrot.slane %v1025_v55, %v3048_v44  ;;  %v1055_v63 = vrot.slane %v1041_v56, %v3048_v44  ;;  %v2398_v38 = vpop.f32.mrb[3].mxu1 }
 0x21d   : > { %v1356_v49 = vpack.c.bf16 %v1056_v48, %v988_v47  ;;  %v1352_v60 = vpack.c.bf16 %v764_v51, %v696_v50  ;;  %v1357_v61 = vpack.c.bf16 %v1057_v54, %v989_v57  ;;  %v733_v17 = vcombine.high %v3099_v11, %v3102_v12 }
 0x21e   : > { %v971_v0 = vrot.slane %v957_v58, %v3048_v44  ;;  %v987_v1 = vrot.slane %v973_v59, %v3048_v44  ;;  %v1058_v3 = vcombine.low %v1039_v62, %v1055_v63  ;;  %v749_v23 = vcombine.high %v3105_v14, %v731_v16 }
 0x21f   : > { %v1365_v52 = vsel %vm1360_vm1, %v1356_v49, 0  ;;  %v1412_v2 = vsel %vm1360_vm1, %v1357_v61, 0  ;;  %v665_v24 = vcombine.high %v639_v18, %v647_v19  ;;  %v681_v25 = vcombine.high %v655_v20, %v663_v21 }
 0x220   : > { %2400 = vmatpush3.bf16.xpose.msra.mxu1 %v1365_v52  ;;  %v697_v4 = vcombine.high %v672_v45, %v688_v46  ;;  %v765_v5 = vcombine.high %v740_v42, %v756_v43  ;;  %v990_v6 = vcombine.low %v971_v0, %v987_v1  ;;  %v747_v8 = vrot.slane %v733_v17, %v3048_v44 }
 0x221   : > { %2405 = vmatprep.subr.bf16.mxu1 %v2755_v53  ;;  %v763_v9 = vrot.slane %v749_v23, %v3048_v44  ;;  %v679_v10 = vrot.slane %v665_v24, %v3048_v44  ;;  %v695_v11 = vrot.slane %v681_v25, %v3048_v44  ;;  %v1059_v16 = vcombine.high %v1039_v62, %v1055_v63 }
 0x222   : > { %v1358_v7 = vpack.c.bf16 %v1058_v3, %v990_v6  ;;  %v1353_v12 = vpack.c.bf16 %v765_v5, %v697_v4  ;;  %v991_v20 = vcombine.high %v971_v0, %v987_v1  ;;  %v385_v30 = vsub.s32 2, %v3004_v13 }
 0x223   : > { %v698_v18 = vcombine.low %v679_v10, %v695_v11  ;;  %v766_v19 = vcombine.low %v747_v8, %v763_v9  ;;  %v699_v26 = vcombine.high %v679_v10, %v695_v11  ;;  %v767_v28 = vcombine.high %v747_v8, %v763_v9 }
 0x224   : > { %v1459_v14 = vsel %vm1360_vm1, %v1358_v7, 0  ;;  %v1359_v21 = vpack.c.bf16 %v1059_v16, %v991_v20  ;;  %v386_v31 = vrot.slane %v3017_v15, %v385_v30 }
 0x225   : > { %v1354_v22 = vpack.c.bf16 %v766_v19, %v698_v18  ;;  %v1355_v29 = vpack.c.bf16 %v767_v28, %v699_v26 }
 0x226   : > { %v1506_v27 = vsel %vm1360_vm1, %v1359_v21, 0  ;;  %v3168_v33 = vadd.f32 %v467_v32, %v386_v31  ;;  %v3170_v36 = vadd.f32 %v470_v35, %v386_v31 }
 0x227   : > { %2402 = vmatmul.mubr.msk.bf16.vlgmr.msra.gmra.mrb[4].mxu1 %vm1360_vm1, %v1352_v60 }
 0x228   : > { %2406 = vmatpush3.bf16.xpose.msra.mxu1 %v1412_v2  ;;  %2407 = vmatprep.mubr.msk.bf16.mxu1 %vm2756_vm0, %v2755_v53 }
 0x229   : > { %2411 = vmatprep.subr.bf16.mxu1 %v2755_v53  ;;  %1062 = vrot.lane.b32.xlu1 %v3168_v33, %s2758_s16 }
 0x22f   : > { %2408 = vmatmul.mubr.msk.bf16.vlgmr.msra.gmra.mrb[8].mxu1 %vm1360_vm1, %v1353_v12 }
 0x230   : > { %2412 = vmatpush3.bf16.xpose.msra.mxu1 %v1459_v14  ;;  %2413 = vmatprep.mubr.msk.bf16.mxu1 %vm2756_vm0, %v2755_v53 }
 0x231   : > { %2417 = vmatprep.subr.bf16.mxu1 %v2755_v53 }
 0x237   : > { %2414 = vmatmul.mubr.msk.bf16.vlgmr.msra.gmra.mrb[12].mxu1 %vm1360_vm1, %v1354_v22 }
 0x238   : > { %2418 = vmatpush3.bf16.xpose.msra.mxu1 %v1506_v27  ;;  %2419 = vmatprep.mubr.msk.bf16.mxu1 %vm2756_vm0, %v2755_v53 }
 0x239   : > { %2423 = vmatprep.subr.bf16.mxu1 %v2755_v53 }
 0x23f   : > { %2420 = vmatmul.mubr.msk.bf16.vlgmr.msra.gmra.mrb[16].mxu1 %vm1360_vm1, %v1355_v29 }
 0x240   : > { %2425 = vmatprep.mubr.msk.bf16.mxu1 %vm2756_vm0, %v2755_v53 }
 0x29b   : > { %v3188_v63 = vpop.permute.xlu1 %1062 }
 0x2fa   : > { %v1401_v39 = vpop.f32.mrb[4].mxu1 }
 0x2fb   : > { %v2403_v40 = vpop.f32.mrb[5].mxu1  ;;  %v1550_v41 = vsel %vm1549_vm2, %v1401_v39, -inf }
 0x2fc   : > { %1551 = vmax.xlane.f32.xlu0 %v1550_v41  ;;  %v1404_v13 = vpop.f32.mrb[6].mxu1 }
 0x2fd   : > { %v2404_v42 = vpop.f32.mrb[7].mxu1  ;;  %v1553_v15 = vsel %vm1549_vm2, %v1404_v13, -inf }
 0x2fe   : > { %1554 = vmax.xlane.f32.xlu1 %v1553_v15 }
 0x302   : > { %v1448_v43 = vpop.f32.mrb[8].mxu1 }
 0x303   : > { %v2409_v45 = vpop.f32.mrb[9].mxu1  ;;  %v1556_v46 = vsel %vm1549_vm2, %v1448_v43, -inf }
 0x304   : > { %1557 = vmax.xlane.f32.xlu0 %v1556_v46  ;;  %v1451_v47 = vpop.f32.mrb[10].mxu1 }
 0x305   : > { %v2410_v48 = vpop.f32.mrb[11].mxu1  ;;  %v1559_v49 = vsel %vm1549_vm2, %v1451_v47, -inf }
 0x308   : > { %1560 = vmax.xlane.f32.xlu0 %v1559_v49 }
 0x30a   : > { %v1495_v50 = vpop.f32.mrb[12].mxu1 }
 0x30b   : > { %v2415_v51 = vpop.f32.mrb[13].mxu1  ;;  %v1562_v52 = vsel %vm1549_vm2, %v1495_v50, -inf }
 0x30c   : > { %1563 = vmax.xlane.f32.xlu1 %v1562_v52  ;;  %v1498_v54 = vpop.f32.mrb[14].mxu1 }
 0x30d   : > { %v2416_v55 = vpop.f32.mrb[15].mxu1  ;;  %v1565_v56 = vsel %vm1549_vm2, %v1498_v54, -inf }
 0x30e   : > { %1566 = vmax.xlane.f32.xlu0 %v1565_v56 }
 0x312   : > { %v1542_v57 = vpop.f32.mrb[16].mxu1 }
 0x313   : > { %v2421_v58 = vpop.f32.mrb[17].mxu1  ;;  %v1568_v59 = vsel %vm1549_vm2, %v1542_v57, -inf }
 0x314   : > { %1569 = vmax.xlane.f32.xlu1 %v1568_v59  ;;  %v1545_v60 = vpop.f32.mrb[18].mxu1 }
 0x315   : > { %v2422_v61 = vpop.f32.mrb[19].mxu1  ;;  %v1571_v62 = vsel %vm1549_vm2, %v1545_v60, -inf }
 0x316   : > { %1572 = vmax.xlane.f32.xlu0 %v1571_v62 }
 0x325   : > { %1068 = vrot.lane.b32.xlu1 %v3168_v33, %s2757_s15 }
 0x329   : > { %1070 = vrot.lane.b32.xlu1 %v3170_v36, %s2757_s15 }
 0x32c   : > { %1064 = vrot.lane.b32.xlu0 %v3170_v36, %s2758_s16 }
 0x389   : > { %v1552_v0 = vpop.xlane.xlu0 %1551 }
 0x38a   : > { %v1574_v1 = vsub.f32 %v1401_v39, %v1552_v0 }
 0x38b   : > { %v1555_v2 = vpop.xlane.xlu1 %1554 }
 0x38c   : > { %v1582_v3 = vmul.f32 1.442695, %v1574_v1  ;;  %v1575_v17 = vsub.f32 %v1404_v13, %v1555_v2 }
 0x38e   : > { %2560 = vpow2.f32 %v1582_v3  ;;  %v1584_v23 = vmul.f32 1.442695, %v1575_v17 }
 0x390   : > { %2562 = vpow2.f32 %v1584_v23 }
 0x391   : > { %v1558_v6 = vpop.xlane.xlu0 %1557 }
 0x392   : > { %v1576_v11 = vsub.f32 %v1448_v43, %v1558_v6 }
 0x394   : > { %v1586_v16 = vmul.f32 1.442695, %v1576_v11 }
 0x395   : > { %v1561_v7 = vpop.xlane.xlu0 %1560 }
 0x396   : > { %v1577_v9 = vsub.f32 %v1451_v47, %v1561_v7 }
 0x398   : > { %v3190_v24 = vpop.eup %2560  ;;  %v1588_v12 = vmul.f32 1.442695, %v1577_v9 }
 0x399   : > { %v1598_v25 = vsel %vm1549_vm2, %v3190_v24, 0.0  ;;  %v1564_v8 = vpop.xlane.xlu1 %1563 }
 0x39a   : > { %v3194_v4 = vpop.eup %2562  ;;  %1599 = vadd.xlane.f32.xlu1 %v1598_v25  ;;  %v1578_v18 = vsub.f32 %v1495_v50, %v1564_v8  ;;  %2564 = vpow2.f32 %v1588_v12 }
 0x39b   : > { %v1601_v5 = vsel %vm1549_vm2, %v3194_v4, 0.0  ;;  %v1567_v19 = vpop.xlane.xlu0 %1566  ;;  %2566 = vpow2.f32 %v1586_v16 }
 0x39c   : > { %1602 = vadd.xlane.f32.xlu0 %v1601_v5  ;;  %v1590_v21 = vmul.f32 1.442695, %v1578_v18  ;;  %v1579_v22 = vsub.f32 %v1498_v54, %v1567_v19 }
 0x39e   : > { %v1592_v26 = vmul.f32 1.442695, %v1579_v22 }
 0x3a1   : > { %v1570_v10 = vpop.xlane.xlu1 %1569 }
 0x3a2   : > { %v1580_v14 = vsub.f32 %v1542_v57, %v1570_v10 }
 0x3a3   : > { %v1573_v27 = vpop.xlane.xlu0 %1572 }
 0x3a4   : > { %v1594_v20 = vmul.f32 1.442695, %v1580_v14  ;;  %v1581_v28 = vsub.f32 %v1545_v60, %v1573_v27  ;;  %v3202_v29 = vpop.eup %2564 }
 0x3a5   : > { %v3204_v31 = vpop.eup %2566  ;;  %v1607_v32 = vsel %vm1549_vm2, %v3202_v29, 0.0  ;;  %v1069_v43 = vpop.permute.xlu1 %1068 }
 0x3a6   : > { %2568 = vpow2.f32 %v1594_v20  ;;  %v1596_v30 = vmul.f32 1.442695, %v1581_v28  ;;  %v1604_v35 = vsel %vm1549_vm2, %v3204_v31, 0.0  ;;  %v1080_v55 = vcombine.low %v3168_v33, %v1069_v43 }
 0x3a7   : > { %2570 = vpow2.f32 %v1590_v21  ;;  %v1065_v46 = vpop.permute.xlu0 %1064  ;;  %v1081_v56 = vcombine.high %v3168_v33, %v1069_v43 }
 0x3a8   : > { %2572 = vpow2.f32 %v1592_v26  ;;  %v1088_v17 = vrot.slane %v1080_v55, %v3045_v37 }
 0x3a9   : > { %2574 = vpow2.f32 %v1596_v30  ;;  %v1071_v45 = vpop.permute.xlu1 %1070 }
 0x3aa   : > { %v1148_v48 = vcombine.low %v3170_v36, %v1071_v45  ;;  %v1149_v49 = vcombine.high %v3170_v36, %v1071_v45 }
 0x3ab   : > { %1076 = vrot.lane.b32.xlu1 %v3170_v36, %s2759_s10 }
 0x3ac   : > { %v1156_v57 = vrot.slane %v1148_v48, %v3045_v37  ;;  %v1163_v58 = vrot.slane %v1149_v49, %v3045_v37 }
 0x3b0   : > { %v3208_v34 = vpop.eup %2568 }
 0x3b1   : > { %v3212_v38 = vpop.eup %2570  ;;  %v1616_v39 = vsel %vm1549_vm2, %v3208_v34, 0.0 }
 0x3b2   : > { %1074 = vrot.lane.b32.xlu0 %v3168_v33, %s2759_s10  ;;  %v1610_v40 = vsel %vm1549_vm2, %v3212_v38, 0.0  ;;  %v3218_v41 = vpop.eup %2572  ;;  %v1095_v33 = vrot.slane %v1081_v56, %v3045_v37 }
 0x3b3   : > { %v1613_v13 = vsel %vm1549_vm2, %v3218_v41, 0.0  ;;  %v3222_v42 = vpop.eup %2574 }
 0x3b4   : > { %v1619_v15 = vsel %vm1549_vm2, %v3222_v42, 0.0 }
 0x3cf   : > { %1608 = vadd.xlane.f32.xlu1 %v1607_v32 }
 0x3d1   : > { %1605 = vadd.xlane.f32.xlu0 %v1604_v35 }
 0x3d3   : > { %1617 = vadd.xlane.f32.xlu1 %v1616_v39 }
 0x3d5   : > { %1611 = vadd.xlane.f32.xlu0 %v1610_v40 }
 0x3d9   : > { %1614 = vadd.xlane.f32.xlu0 %v1613_v13 }
 0x3dd   : > { %1620 = vadd.xlane.f32.xlu0 %v1619_v15 }
 0x427   : > { %v1600_v47 = vpop.xlane.xlu1 %1599 }
 0x428   : > { %2576 = vrcp.f32 %v1600_v47 }
 0x429   : > { %v1603_v50 = vpop.xlane.xlu0 %1602 }
 0x42a   : > { %2578 = vrcp.f32 %v1603_v50 }
 0x42b   : > { %v1077_v51 = vpop.permute.xlu1 %1076 }
 0x42c   : > { %v1164_v52 = vcombine.low %v1065_v46, %v1077_v51  ;;  %v1165_v54 = vcombine.high %v1065_v46, %v1077_v51 }
 0x42d   : > { %v1075_v59 = vpop.permute.xlu0 %1074 }
 0x42e   : > { %v1172_v60 = vrot.slane %v1164_v52, %v3045_v37  ;;  %v1179_v61 = vrot.slane %v1165_v54, %v3045_v37  ;;  %v1096_v62 = vcombine.low %v3188_v63, %v1075_v59  ;;  %v1097_v36 = vcombine.high %v3188_v63, %v1075_v59 }
 0x430   : > { %v1180_v0 = vcombine.low %v1156_v57, %v1172_v60  ;;  %v1181_v1 = vcombine.high %v1156_v57, %v1172_v60  ;;  %v1196_v2 = vcombine.low %v1163_v58, %v1179_v61  ;;  %v1197_v3 = vcombine.high %v1163_v58, %v1179_v61 }
 0x431   : > { %v1104_v23 = vrot.slane %v1096_v62, %v3045_v37  ;;  %v1111_v25 = vrot.slane %v1097_v36, %v3045_v37 }
 0x432   : > { %v1188_v5 = vrot.slane %v1180_v0, %v3048_v44  ;;  %v1195_v6 = vrot.slane %v1181_v1, %v3048_v44  ;;  %v1204_v7 = vrot.slane %v1196_v2, %v3048_v44  ;;  %v1211_v63 = vrot.slane %v1197_v3, %v3048_v44  ;;  %v2577_v49 = vpop.eup %2576 }
 0x433   : > { %v1112_v8 = vcombine.low %v1088_v17, %v1104_v23  ;;  %v1113_v9 = vcombine.high %v1088_v17, %v1104_v23  ;;  %v1128_v10 = vcombine.low %v1095_v33, %v1111_v25  ;;  %v1129_v20 = vcombine.high %v1095_v33, %v1111_v25 }
 0x434   : > { %v1284_v11 = vcombine.low %v1188_v5, %v1195_v6  ;;  %v2305_v12 = vcombine.high %v1188_v5, %v1195_v6  ;;  %v1300_v14 = vcombine.low %v1204_v7, %v1211_v63  ;;  %v2306_v16 = vcombine.high %v1204_v7, %v1211_v63  ;;  %v2579_v55 = vpop.eup %2578 }
 0x435   : > { %v1120_v18 = vrot.slane %v1112_v8, %v3048_v44  ;;  %v1127_v19 = vrot.slane %v1113_v9, %v3048_v44  ;;  %v1136_v28 = vrot.slane %v1128_v10, %v3048_v44  ;;  %v1143_v30 = vrot.slane %v1129_v20, %v3048_v44 }
 0x436   : > { %v1291_v21 = vrot.slane %v1284_v11, %v3045_v37  ;;  %v1299_v22 = vrot.slane %v2305_v12, %v3045_v37  ;;  %v1307_v27 = vrot.slane %v1300_v14, %v3045_v37  ;;  %v1315_v26 = vrot.slane %v2306_v16, %v3045_v37 }
 0x437   : > { %v1216_v32 = vcombine.low %v1120_v18, %v1127_v19  ;;  %v2303_v35 = vcombine.high %v1120_v18, %v1127_v19  ;;  %v1232_v43 = vcombine.low %v1136_v28, %v1143_v30  ;;  %v2304_v45 = vcombine.high %v1136_v28, %v1143_v30 }
 0x438   : > { %v1316_v39 = vcombine.low %v1291_v21, %v1299_v22  ;;  %v1332_v40 = vcombine.low %v1307_v27, %v1315_v26  ;;  %v1631_v59 = vmul.f32 %v2579_v55, %v3194_v4  ;;  %v1630_v62 = vmul.f32 %v2577_v49, %v3190_v24  ;;  %v356_v49 = vld [vmem:[#allocation7 + $0x38] sm:$0xff]  ;;  %v359_v55 = vld [vmem:[#allocation7 + $0x50] sm:$0xff] }
 0x439   : > { %v1223_v13 = vrot.slane %v1216_v32, %v3045_v37  ;;  %v1231_v15 = vrot.slane %v2303_v35, %v3045_v37  ;;  %v1239_v46 = vrot.slane %v1232_v43, %v3045_v37  ;;  %v1247_v47 = vrot.slane %v2304_v45, %v3045_v37  ;;  %v351_v43 = vld [vmem:[#allocation7 + $0x10] sm:$0xff]  ;;  %v352_v45 = vld [vmem:[#allocation7 + $0x18] sm:$0xff] }
 0x43a   : > { %v1324_v52 = vrot.slane %v1316_v39, %v3048_v44  ;;  %v1340_v54 = vrot.slane %v1332_v40, %v3048_v44  ;;  %v1638_v0 = vpack.c.bf16 %v1631_v59, %v1630_v62  ;;  %v1317_v33 = vcombine.high %v1291_v21, %v1299_v22  ;;  %v362_v59 = vld [vmem:[#allocation7 + $0x68] sm:$0xff] }
 0x43b   : > { %v1248_v48 = vcombine.low %v1223_v13, %v1231_v15  ;;  %v1264_v51 = vcombine.low %v1239_v46, %v1247_v47  ;;  %v1249_v3 = vcombine.high %v1223_v13, %v1231_v15  ;;  %v1265_v24 = vcombine.high %v1239_v46, %v1247_v47  ;;  %v353_v47 = vld [vmem:[#allocation7 + $0x20] sm:$0xff] }
 0x43c   : > { %v1348_v58 = vcombine.low %v1324_v52, %v1340_v54  ;;  %v1349_v36 = vcombine.high %v1324_v52, %v1340_v54  ;;  %v1333_v23 = vcombine.high %v1307_v27, %v1315_v26  ;;  %v1331_v63 = vrot.slane %v1317_v33, %v3048_v44  ;;  %v358_v52 = vld [vmem:[#allocation7 + $0x48] sm:$0xff] }
 0x43d   : > { %v1256_v50 = vrot.slane %v1248_v48, %v3048_v44  ;;  %v1272_v56 = vrot.slane %v1264_v51, %v3048_v44  ;;  %v1263_v25 = vrot.slane %v1249_v3, %v3048_v44  ;;  %v1279_v5 = vrot.slane %v1265_v24, %v3048_v44  ;;  %v354_v48 = vld [vmem:[#allocation7 + $0x28] sm:$0xff]  ;;  %v357_v51 = vld [vmem:[#allocation7 + $0x40] sm:$0xff] }
 0x43e   : > { %v1347_v8 = vrot.slane %v1333_v23, %v3048_v44  ;;  %v366_v46 = vpack.c.bf16 %v352_v45, %v351_v43  ;;  %v369_v54 = vpack.c.bf16 %v358_v52, %v357_v51 }
 0x43f   : > { %v1280_v57 = vcombine.low %v1256_v50, %v1272_v56  ;;  %v1281_v61 = vcombine.high %v1256_v50, %v1272_v56  ;;  %v1282_v10 = vcombine.low %v1263_v25, %v1279_v5  ;;  %v360_v56 = vld [vmem:[#allocation7 + $0x58] sm:$0xff] }
 0x440   : > { %v1350_v18 = vcombine.low %v1331_v63, %v1347_v8  ;;  %v1351_v26 = vcombine.high %v1331_v63, %v1347_v8 }
 0x441   : > { %v1642_v60 = vpack.c.bf16 %v1348_v58, %v1280_v57  ;;  %v1643_v1 = vpack.c.bf16 %v1349_v36, %v1281_v61  ;;  %v370_v57 = vpack.c.bf16 %v360_v56, %v359_v55  ;;  %v361_v58 = vld [vmem:[#allocation7 + $0x60] sm:$0xff] }
 0x442   : > { %v1644_v20 = vpack.c.bf16 %v1350_v18, %v1282_v10  ;;  %v371_v62 = vpack.c.bf16 %v362_v59, %v361_v58 }
 0x443   : > { %2424 = vmatpush3.bf16.msra.mxu1 %v1642_v60 }
 0x444   : > { %2429 = vmatprep.subr.bf16.mxu1 %v2755_v53 }
 0x446   : > { %2426 = vmatmul.mubr.msk.bf16.vlgmr.msra.gmra.mrb[20].mxu1 %vm1549_vm2, %v1638_v0 }
 0x447   : > { %2430 = vmatpush3.bf16.msra.mxu1 %v1643_v1  ;;  %2431 = vmatprep.mubr.msk.bf16.mxu1 %vm2756_vm0, %v2755_v53 }
 0x448   : > { %2435 = vmatprep.subr.bf16.mxu1 %v2755_v53 }
 0x45c   : > { %v1609_v2 = vpop.xlane.xlu1 %1608 }
 0x45d   : > { %2580 = vrcp.f32 %v1609_v2 }
 0x45e   : > { %v1606_v4 = vpop.xlane.xlu0 %1605 }
 0x45f   : > { %2582 = vrcp.f32 %v1606_v4 }
 0x460   : > { %v1618_v14 = vpop.xlane.xlu1 %1617 }
 0x462   : > { %v1612_v17 = vpop.xlane.xlu0 %1611 }
 0x463   : > { %2584 = vrcp.f32 %v1612_v17 }
 0x466   : > { %v1615_v6 = vpop.xlane.xlu0 %1614 }
 0x467   : > { %v2581_v7 = vpop.eup %2580  ;;  %2586 = vrcp.f32 %v1615_v6 }
 0x468   : > { %v1633_v11 = vmul.f32 %v2581_v7, %v3202_v29  ;;  %v1283_v29 = vcombine.high %v1263_v25, %v1279_v5 }
 0x469   : > { %v2583_v9 = vpop.eup %2582 }
 0x46a   : > { %v1632_v12 = vmul.f32 %v2583_v9, %v3204_v31  ;;  %v1621_v16 = vpop.xlane.xlu0 %1620  ;;  %v1645_v32 = vpack.c.bf16 %v1351_v26, %v1283_v29 }
 0x46b   : > { %2588 = vrcp.f32 %v1621_v16 }
 0x46c   : > { %v1639_v19 = vpack.c.bf16 %v1633_v11, %v1632_v12  ;;  %2590 = vrcp.f32 %v1618_v14 }
 0x46d   : > { %v2585_v21 = vpop.eup %2584 }
 0x46e   : > { %2432 = vmatmul.mubr.msk.bf16.vlgmr.msra.gmra.mrb[24].mxu1 %vm1549_vm2, %v1639_v19  ;;  %v1634_v31 = vmul.f32 %v2585_v21, %v3212_v38  ;;  %v349_v38 = vld [vmem:[#allocation7] sm:$0xff] }
 0x46f   : > { %2436 = vmatpush3.bf16.msra.mxu1 %v1644_v20  ;;  %2437 = vmatprep.mubr.msk.bf16.mxu1 %vm2756_vm0, %v2755_v53 }
 0x470   : > { %2441 = vmatprep.subr.bf16.mxu1 %v2755_v53 }
 0x471   : > { %v2587_v22 = vpop.eup %2586 }
 0x472   : > { %v1635_v27 = vmul.f32 %v2587_v22, %v3218_v41  ;;  %v350_v41 = vld [vmem:[#allocation7 + $0x8] sm:$0xff] }
 0x473   : > { %v365_v15 = vpack.c.bf16 %v350_v41, %v349_v38 }
 0x474   : > { %v1640_v28 = vpack.c.bf16 %v1635_v27, %v1634_v31 }
 0x475   : > { %v2589_v30 = vpop.eup %2588  ;;  %2448 = vmatpush3.bf16.xpose.msra.mxu0 %v365_v15 }
 0x476   : > { %2438 = vmatmul.mubr.msk.bf16.vlgmr.msra.gmra.mrb[28].mxu1 %vm1549_vm2, %v1640_v28  ;;  %v2591_v35 = vpop.eup %2590  ;;  %v1637_v39 = vmul.f32 %v2589_v30, %v3222_v42  ;;  %2449 = vmatprep.subr.bf16.mxu0 %v2755_v53  ;;  %v367_v42 = vpack.c.bf16 %v354_v48, %v353_v47 }
 0x477   : > { %2442 = vmatpush3.bf16.msra.mxu1 %v1645_v32  ;;  %2443 = vmatprep.mubr.msk.bf16.mxu1 %vm2756_vm0, %v2755_v53  ;;  %v1636_v40 = vmul.f32 %v2591_v35, %v3208_v34  ;;  %v355_v34 = vld [vmem:[#allocation7 + $0x30] sm:$0xff] }
 0x478   : > { %v368_v50 = vpack.c.bf16 %v356_v49, %v355_v34 }
 0x479   : > { %v1641_v13 = vpack.c.bf16 %v1637_v39, %v1636_v40 }
 0x47d   : > { %2450 = vmatpush3.bf16.xpose.msra.mxu0 %v366_v46 }
 0x47e   : > { %2444 = vmatmul.mubr.msk.bf16.vlgmr.msra.gmra.mrb[32].mxu1 %vm1549_vm2, %v1641_v13  ;;  %2451 = vmatprep.subr.bf16.mxu0 %v2755_v53 }
 0x485   : > { %2452 = vmatpush3.bf16.xpose.msra.mxu0 %v367_v42 }
 0x486   : > { %2453 = vmatprep.subr.bf16.mxu0 %v2755_v53 }
 0x48d   : > { %2454 = vmatpush3.bf16.xpose.msra.mxu0 %v368_v50 }
 0x48e   : > { %2455 = vmatprep.subr.bf16.mxu0 %v2755_v53 }
 0x495   : > { %2456 = vmatpush3.bf16.xpose.msra.mxu0 %v369_v54 }
 0x496   : > { %2457 = vmatprep.subr.bf16.mxu0 %v2755_v53 }
 0x49d   : > { %2458 = vmatpush3.bf16.xpose.msra.mxu0 %v370_v57 }
 0x49e   : > { %2459 = vmatprep.subr.bf16.mxu0 %v2755_v53 }
 0x4a5   : > { %2460 = vmatpush3.bf16.xpose.msra.mxu0 %v371_v62 }
 0x4a6   : > { %2461 = vmatprep.subr.bf16.mxu0 %v2755_v53 }
 0x519   : > { %v1683_v60 = vpop.f32.mrb[20].mxu1 }
 0x51a   : > { %v2427_v61 = vpop.f32.mrb[21].mxu1 }
 0x51b   : > { %v1686_v36 = vpop.f32.mrb[22].mxu1 }
 0x51c   : > { %v2428_v0 = vpop.f32.mrb[23].mxu1 }
 0x541   : > { %v1727_v1 = vpop.f32.mrb[24].mxu1 }
 0x542   : > { %v2433_v2 = vpop.f32.mrb[25].mxu1 }
 0x543   : > { %v1730_v4 = vpop.f32.mrb[26].mxu1 }
 0x544   : > { %v2434_v3 = vpop.f32.mrb[27].mxu1 }
 0x549   : > { %v1771_v24 = vpop.f32.mrb[28].mxu1 }
 0x54a   : > { %v1822_v17 = vcombine.low %v1683_v60, %v1771_v24  ;;  %v1823_v33 = vcombine.high %v1683_v60, %v1771_v24  ;;  %v2439_v23 = vpop.f32.mrb[29].mxu1 }
 0x54b   : > { %v1774_v25 = vpop.f32.mrb[30].mxu1 }
 0x54c   : > { %v1890_v5 = vcombine.low %v1686_v36, %v1774_v25  ;;  %v1891_v6 = vcombine.high %v1686_v36, %v1774_v25  ;;  %v2440_v7 = vpop.f32.mrb[31].mxu1  ;;  %v1830_v11 = vrot.slane %v1822_v17, %v3045_v37  ;;  %v1837_v53 = vrot.slane %v1823_v33, %v3045_v37 }
 0x54d   : > { %v364_v7 = vld [vmem:[#allocation7 + $0x78] sm:$0xff] }
 0x54e   : > { %v1898_v27 = vrot.slane %v1890_v5, %v3045_v37  ;;  %v1905_v26 = vrot.slane %v1891_v6, %v3045_v37  ;;  %v363_v6 = vld [vmem:[#allocation7 + $0x70] sm:$0xff] }
 0x551   : > { %v1815_v63 = vpop.f32.mrb[32].mxu1 }
 0x552   : > { %v1838_v8 = vcombine.low %v1727_v1, %v1815_v63  ;;  %v1839_v9 = vcombine.high %v1727_v1, %v1815_v63  ;;  %v2445_v10 = vpop.f32.mrb[33].mxu1 }
 0x553   : > { %v1818_v12 = vpop.f32.mrb[34].mxu1 }
 0x554   : > { %v1846_v14 = vrot.slane %v1838_v8, %v3045_v37  ;;  %v1853_v16 = vrot.slane %v1839_v9, %v3045_v37  ;;  %v1906_v18 = vcombine.low %v1730_v4, %v1818_v12  ;;  %v1907_v19 = vcombine.high %v1730_v4, %v1818_v12  ;;  %v2446_v20 = vpop.f32.mrb[35].mxu1 }
 0x556   : > { %v1854_v21 = vcombine.low %v1830_v11, %v1846_v14  ;;  %v1855_v22 = vcombine.high %v1830_v11, %v1846_v14  ;;  %v1870_v29 = vcombine.low %v1837_v53, %v1853_v16  ;;  %v1871_v31 = vcombine.high %v1837_v53, %v1853_v16 }
 0x557   : > { %v1914_v28 = vrot.slane %v1906_v18, %v3045_v37  ;;  %v1921_v30 = vrot.slane %v1907_v19, %v3045_v37  ;;  %v372_v14 = vpack.c.bf16 %v364_v7, %v363_v6 }
 0x558   : > { %v1862_v32 = vrot.slane %v1854_v21, %v3048_v44  ;;  %v1869_v35 = vrot.slane %v1855_v22, %v3048_v44  ;;  %v1878_v39 = vrot.slane %v1870_v29, %v3048_v44  ;;  %v1885_v40 = vrot.slane %v1871_v31, %v3048_v44 }
 0x559   : > { %v1922_v13 = vcombine.low %v1898_v27, %v1914_v28  ;;  %v1923_v38 = vcombine.high %v1898_v27, %v1914_v28  ;;  %v1938_v41 = vcombine.low %v1905_v26, %v1921_v30  ;;  %v1939_v15 = vcombine.high %v1905_v26, %v1921_v30  ;;  %2462 = vmatpush3.bf16.xpose.msra.mxu0 %v372_v14 }
 0x55a   : > { %v1958_v43 = vcombine.low %v1862_v32, %v1869_v35  ;;  %v2315_v45 = vcombine.high %v1862_v32, %v1869_v35  ;;  %v1974_v46 = vcombine.low %v1878_v39, %v1885_v40  ;;  %v2316_v47 = vcombine.high %v1878_v39, %v1885_v40 }
 0x55b   : > { %v1930_v48 = vrot.slane %v1922_v13, %v3048_v44  ;;  %v1937_v42 = vrot.slane %v1923_v38, %v3048_v44  ;;  %v1946_v34 = vrot.slane %v1938_v41, %v3048_v44  ;;  %v1953_v49 = vrot.slane %v1939_v15, %v3048_v44 }
 0x55c   : > { %v1965_v50 = vrot.slane %v1958_v43, %v3045_v37  ;;  %v1973_v51 = vrot.slane %v2315_v45, %v3045_v37  ;;  %v1981_v52 = vrot.slane %v1974_v46, %v3045_v37  ;;  %v1989_v54 = vrot.slane %v2316_v47, %v3045_v37  ;;  %v2319_v46 = vld [vmem:[%s3388_s4] ss:$0 sm:$0xff] }
 0x55d   : > { %v2026_v55 = vcombine.low %v1930_v48, %v1937_v42  ;;  %v2317_v56 = vcombine.high %v1930_v48, %v1937_v42  ;;  %v2042_v57 = vcombine.low %v1946_v34, %v1953_v49  ;;  %v2318_v58 = vcombine.high %v1946_v34, %v1953_v49 }
 0x55e   : > { %v1991_v59 = vcombine.high %v1965_v50, %v1973_v51  ;;  %v2007_v60 = vcombine.high %v1981_v52, %v1989_v54  ;;  %v1990_v61 = vcombine.low %v1965_v50, %v1973_v51  ;;  %v2006_v62 = vcombine.low %v1981_v52, %v1989_v54 }
 0x55f   : > { %v2033_v36 = vrot.slane %v2026_v55, %v3045_v37  ;;  %v2041_v0 = vrot.slane %v2317_v56, %v3045_v37  ;;  %v2049_v1 = vrot.slane %v2042_v57, %v3045_v37  ;;  %v2057_v2 = vrot.slane %v2318_v58, %v3045_v37 }
 0x560   : > { %v2005_v4 = vrot.slane %v1991_v59, %v3048_v44  ;;  %v2021_v3 = vrot.slane %v2007_v60, %v3048_v44  ;;  %v1998_v24 = vrot.slane %v1990_v61, %v3048_v44  ;;  %v2014_v17 = vrot.slane %v2006_v62, %v3048_v44 }
 0x561   : > { %v2059_v33 = vcombine.high %v2033_v36, %v2041_v0  ;;  %v2075_v23 = vcombine.high %v2049_v1, %v2057_v2  ;;  %v2058_v25 = vcombine.low %v2033_v36, %v2041_v0  ;;  %v2074_v5 = vcombine.low %v2049_v1, %v2057_v2 }
 0x562   : > { %v2024_v63 = vcombine.low %v2005_v4, %v2021_v3  ;;  %v2022_v8 = vcombine.low %v1998_v24, %v2014_v17  ;;  %v2023_v9 = vcombine.high %v1998_v24, %v2014_v17  ;;  %v2025_v10 = vcombine.high %v2005_v4, %v2021_v3 }
 0x563   : > { %v2073_v37 = vrot.slane %v2059_v33, %v3048_v44  ;;  %v2089_v11 = vrot.slane %v2075_v23, %v3048_v44  ;;  %v2066_v53 = vrot.slane %v2058_v25, %v3048_v44  ;;  %v2082_v12 = vrot.slane %v2074_v5, %v3048_v44 }
 0x565   : > { %v2092_v16 = vcombine.low %v2073_v37, %v2089_v11  ;;  %v2091_v18 = vcombine.high %v2066_v53, %v2082_v12  ;;  %v2090_v19 = vcombine.low %v2066_v53, %v2082_v12  ;;  %v2093_v20 = vcombine.high %v2073_v37, %v2089_v11 }
 0x567   : > { %v2550_v21 = vpack.i.bf16 %v2092_v16, %v2024_v63  ;;  %v2545_v22 = vpack.i.bf16 %v2091_v18, %v2023_v9  ;;  %v2555_v29 = vpack.i.bf16 %v2093_v20, %v2025_v10 }
 0x569   : > { %2551 = vrot.lane.b32.xlu0 %v2550_v21, %s2757_s15  ;;  %2546 = vrot.lane.b32.xlu1 %v2545_v22, %s2759_s10 }
 0x56d   : > { %2556 = vrot.lane.b32.xlu1 %v2555_v29, %s2758_s16 }
 0x5db   : > { %v2552_v31 = vpop.permute.xlu0 %2551  ;;  %v2547_v27 = vpop.permute.xlu1 %2546 }
 0x5dc   : > { %v2549_v26 = vunpack.i.h.bf16 %v2547_v27  ;;  %v2548_v28 = vunpack.i.l.bf16 %v2547_v27  ;;  %v2554_v44 = vunpack.i.h.bf16 %v2552_v31  ;;  %v2553_v30 = vunpack.i.l.bf16 %v2552_v31 }
 0x5de   : > { %v2118_v32 = vsel %vm1360_vm1, %v2022_v8, %v2548_v28  ;;  %v2119_v35 = vsel %vm1360_vm1, %v2090_v19, %v2549_v26 }
 0x5df   : > { %v2557_v39 = vpop.permute.xlu1 %2556  ;;  %v2121_v38 = vsel %vm2120_vm3, %v2118_v32, %v2553_v30  ;;  %v2122_v41 = vsel %vm2120_vm3, %v2119_v35, %v2554_v44 }
 0x5e0   : > { %v2559_v40 = vunpack.i.h.bf16 %v2557_v39  ;;  %v2558_v13 = vunpack.i.l.bf16 %v2557_v39 }
 0x5e2   : > { %v2124_v15 = vsel %vm2123_vm4, %v2121_v38, %v2558_v13  ;;  %v2125_v43 = vsel %vm2123_vm4, %v2122_v41, %v2559_v40 }
 0x5e3   : > { %v2126_v45 = vpack.c.bf16 %v2125_v43, %v2124_v15 }
 0x5e5   : > { %2464 = vmatmul.mubr.bf16.vlgmr.msra.gmra.mrb[4].mxu0 %v2126_v45 }
 0x6b8   : > { %v2167_v47 = vpop.f32.mrb[4].mxu0 }
 0x6b9   : > { %v2168_v48 = vadd.f32 %v2319_v46, %v2167_v47  ;;  %v2465_v42 = vpop.f32.mrb[5].mxu0 }
 0x6ba   : > { %v2170_v34 = vpop.f32.mrb[6].mxu0 }
 0x6bb   : > { %2174 = vst [vmem:[%s271_s9] sm:$0xff] %v2168_v48  ;;  %v2171_v49 = vadd.f32 %v2319_v46, %v2170_v34  ;;  %v2466_v50 = vpop.f32.mrb[7].mxu0 }
 0x6bd   : > { %2175 = vst [vmem:[%s271_s9 + $0x8] sm:$0xff] %v2171_v49 }
 0x6be   : > { %2691 = shalt.err (!%p2688_p1)
}
 0x6bf   : > { %s2692_s15 = scalar_lea.hbm %s3340_s8, 256  ;;  %s2696_s28 = scalar_lea.hbm %s3389_s5, 512 }
 0x6c0   : > { %p2693_p13 = scmp.ne.s32.totalorder %s3340_s8, %s2692_s15  ;;  %p2697_p4 = scmp.lt.u32.totalorder %s3340_s8, %s3389_s5 }
 0x6c1   : > { %p2698_p5 = scmp.lt.u32.totalorder %s2696_s28, %s2692_s15  ;;  %p2700_p11 = scmp.lt.u32.totalorder %s2692_s15, %s3340_s8 }
 0x6c2   : > { %p2694_p6 = pnand %p2693_p13, %p3403_p0 }
 0x6c3   : > { %p2699_p8 = por %p2698_p5, %p2697_p4 }
 0x6c4   : > { %p2695_p10 = pneg %p2694_p6 }
 0x6c5   : > { %p2701_p2 = por %p2700_p11, %p2699_p8 }
 0x6c7   : > { %p2702_p3 = pnand %p2701_p2, %p2695_p10 }
 0x6c9   : > { %2705 = shalt.err (!%p2702_p3)
}
 0x6ca   : > { %s2763_s11 = smov 128   ;;  %s2764_s17 = smov 8  }
 0x6cb   : > { %2477 = dma.vmem_to_hbm [thread:$0]  (%p3403_p0), %s3335_s30, 256, %s3340_s8, %s2177_s6, %s2763_s11, %s2763_s11, %s2764_s17  }
 0x6cc PF: > { %s2205_s7 = sand.u32 1, %s2736_s18   ;;  %p3404_p7 = scmp.ne.s32.totalorder %s3394_s25, 0 }
 0x6cd   : > { %p3405_p9 = scmp.ge.s32.totalorder %s2748_s21, 2  ;;  %s2206_s22 = scalar_lea.sflag [#allocation4], %s2205_s7 }
 0x6cf   : > { %p2491_p12 = pnand %p3405_p9, %p3404_p7 }
 0x6d1   : > { %2731 = dma.done.wait (!%p2491_p12), %s2206_s22, 256  }
 0x6d2   : > { %2733 = vsyncadd (!%p2491_p12), %s2206_s22, 4294967040  ;;  %p19_p1 = scmp.ge.s32.totalorder %s2911_s29, 4   ;;  %s3406_s18 = smov %s2740_s19 }
 0x6d3   : > { %s3407_s19 = smov %s2744_s20  ;;  %s3408_s20 = smov %s2927_s27 }
 0x6d4   : > { %s3409_s21 = smov %s2911_s29  ;;  %21 = sbr.rel (!%p19_p1) target bundleno = 6 (0x6), region = 93 }
 0x6db   :  { %2211 = vsyncpa [#allocation3], 1 }
 0x6dc   :  { %2213 = vsyncpa [#allocation3 + $0x1], 1 }
 0x6dd   :  { %2214 = vsyncpa [#allocation6], 1 }
 0x6de   :  { %2215 = vsyncpa [#allocation4], 1 }
 0x6df   :  { %2217 = vsyncpa [#allocation4 + $0x1], 1 }

</bundles_post_ra>
